<compile_context>
chip_gen: v5e
topology: v5e:2x2
jax: 0.10.0
libtpu: 0.0.40
codegen_flags: <defaults>
</compile_context>

<pallas_src>
import functools

import jax
import jax.numpy as jnp
import numpy as np
from jax.experimental import pallas as pl
from jax.experimental.pallas import tpu as pltpu

BN_EPS = 1e-5
LEAKY_SLOPE = 0.01  # F.leaky_relu default
NEG_BIG = -1e30


def nas_layer_kernel(x_ref, gamma_ref, beta_ref, bias_ref, wbig_ref, ybias_ref,
                     out_ref, *, num_heads, cout, blk):
    # ---- BatchNorm1d (training-mode batch statistics), once per graph ----
    x = x_ref[...]                                           # (N, Cin)
    mean = jnp.mean(x, axis=0, keepdims=True)                # (1, Cin)
    var = jnp.mean((x - mean) ** 2, axis=0, keepdims=True)   # biased variance
    rstd = jax.lax.rsqrt(var + BN_EPS)
    xn = (x - mean) * (gamma_ref[...] * rstd) + beta_ref[...]

    # ---- Fused AttentionPrepare for ALL heads in one MXU push ----
    # y column layout (blk = 16-lane-aligned per-head block):
    #   [ ft_0 (cout) | 1 | 0-pad ]  [ ft_1 (cout) | 1 | 0-pad ]  [a1_0 a1_1 a2_0 a2_1]
    # The constant ones columns come from the bias row (can't be produced by a
    # pure linear map), so no in-kernel concatenate is needed for [ft | 1].
    y = jnp.dot(xn, wbig_ref[...],
                preferred_element_type=jnp.float32) + ybias_ref[...]

    # Hoisted, head-invariant terms.
    mask_bias = bias_ref[...].astype(jnp.float32)            # 0 / -1e30, one upcast
    a_off = num_heads * blk
    a1_all = y[:, a_off:a_off + num_heads]                   # (N, H) dst terms
    a2_all = y[:, a_off + num_heads:a_off + 2 * num_heads]   # (N, H) src terms
    a2_t = jnp.transpose(a2_all)                             # (H, N): ONE XLU transpose

    head_outs = []
    for h in range(num_heads):                               # static unroll (H=2)
        # GATReduce: leaky_relu + additive mask bias (no per-head vselect).
        scores = a1_all[:, h:h + 1] + a2_t[h:h + 1, :]       # (N_dst, N_src)
        scores = jnp.maximum(scores, LEAKY_SLOPE * scores) + mask_bias
        smax = jnp.max(scores, axis=-1, keepdims=True)
        p = jnp.exp(scores - smax)                           # exactly 0 where masked

        # SumAggregator + softmax denominator in ONE matmul: RHS is the
        # contiguous, 16-lane-aligned [ft_h | 1 | 0-pad] slab of y.
        agg = jnp.dot(p, y[:, h * blk:(h + 1) * blk],
                      preferred_element_type=jnp.float32)    # (N, blk)
        accum = agg[:, :cout]                                # (N, Cout)
        denom = agg[:, cout:cout + 1]                        # (N, 1), >= 1

        # GATFinalize: normalize after aggregation, relu, no residual.
        # approx reciprocal (EUP) + one Newton step -> ~1e-5 rel error.
        r = pl.reciprocal(denom, approx=True)
        r = r * (2.0 - denom * r)
        head_outs.append(jnp.maximum(accum * r, 0.0))

    # Single coalesced (N, H*Cout) store instead of H masked 8-lane stores.
    out_ref[...] = jnp.concatenate(head_outs, axis=-1)


def nas_layer_forward(x, adj, gamma, beta, w_fc, w_l, w_r):
    """x: (B, N, Cin), adj: (B, N, N), w_fc: (H, Cin, Cout), w_l/w_r: (H, Cout, A)."""
    B, N, Cin = x.shape
    H, _, Cout = w_fc.shape

    # Per-head [ft | 1 | pad] block padded to an 8-lane multiple (16 for Cout=8).
    blk = ((Cout + 1 + 7) // 8) * 8
    Wt = H * blk + 2 * H

    # Fold the attn_l / attn_r projections (summed over attention dim A) into the
    # fc weights:  a1 = sum_A(ft @ w_l) = xn @ (w_fc @ sum_A(w_l)).
    wl_sum = jnp.sum(w_l, axis=-1)                            # (H, Cout)
    wr_sum = jnp.sum(w_r, axis=-1)                            # (H, Cout)
    w_a1 = jnp.einsum('hio,ho->hi', w_fc, wl_sum)             # (H, Cin)
    w_a2 = jnp.einsum('hio,ho->hi', w_fc, wr_sum)             # (H, Cin)

    w_big = jnp.zeros((Cin, Wt), jnp.float32)
    y_bias = jnp.zeros((1, Wt), jnp.float32)
    for h in range(H):
        w_big = w_big.at[:, h * blk:h * blk + Cout].set(w_fc[h])
        y_bias = y_bias.at[0, h * blk + Cout].set(1.0)        # the "ones" column
        w_big = w_big.at[:, H * blk + h].set(w_a1[h])
        w_big = w_big.at[:, H * blk + H + h].set(w_a2[h])

    # Additive softmax mask bias, shipped as bf16 (half the HBM bytes of f32 adj).
    mask_bias = jnp.where(adj > 0, 0.0, NEG_BIG).astype(jnp.bfloat16)

    kernel = functools.partial(nas_layer_kernel, num_heads=H, cout=Cout, blk=blk)

    return pl.pallas_call(
        kernel,
        out_shape=jax.ShapeDtypeStruct((B, N, H * Cout), jnp.float32),
        grid=(B,),
        in_specs=[
            pl.BlockSpec((None, N, Cin), lambda b: (b, 0, 0)),   # x (per graph)
            pl.BlockSpec((1, Cin), lambda b: (0, 0)),            # gamma (resident)
            pl.BlockSpec((1, Cin), lambda b: (0, 0)),            # beta  (resident)
            pl.BlockSpec((None, N, N), lambda b: (b, 0, 0)),     # mask bias (bf16)
            pl.BlockSpec((Cin, Wt), lambda b: (0, 0)),           # w_big (resident)
            pl.BlockSpec((1, Wt), lambda b: (0, 0)),             # y_bias (resident)
        ],
        out_specs=pl.BlockSpec((None, N, H * Cout), lambda b: (b, 0, 0)),
        compiler_params=pltpu.CompilerParams(
            dimension_semantics=("parallel",)),
    )(x, gamma, beta, mask_bias, w_big, y_bias)


def reference_forward(x, adj, gamma, beta, w_fc, w_l, w_r):
    """Pure-JAX reference mirroring the PyTorch/DGL semantics (per graph)."""
    def single(xg, adjg):
        mean = jnp.mean(xg, axis=0, keepdims=True)
        var = jnp.mean((xg - mean) ** 2, axis=0, keepdims=True)
        xn = (xg - mean) / jnp.sqrt(var + BN_EPS) * gamma + beta
        outs = []
        for h in range(w_fc.shape[0]):
            ft = xn @ w_fc[h]
            a1 = (ft @ w_l[h]).sum(-1, keepdims=True)
            a2 = (ft @ w_r[h]).sum(-1, keepdims=True)
            s = a1 + a2.T
            s = jnp.where(s > 0, s, LEAKY_SLOPE * s)
            s = jnp.where(adjg > 0, s, -jnp.inf)
            e = jax.nn.softmax(s, axis=-1)
            e = jnp.where(adjg > 0, e, 0.0)
            outs.append(jnp.maximum(e @ ft, 0.0))
        return jnp.concatenate(outs, axis=1)
    return jnp.stack([single(x[b], adj[b]) for b in range(x.shape[0])])


if __name__ == "__main__":
    # Small, TPU-friendly shapes; B graphs batched into one pallas_call.
    B = 2             # graphs per call (grid axis, 'parallel')
    N = 128           # nodes per graph
    Cin = 16          # in_channels
    Cout = 8          # out_channels
    H = 2             # head_num
    A = 1             # attention_dim for attention_type='gat'

    key = jax.random.PRNGKey(0)
    kx, kfc, kl, kr, kg, kb = jax.random.split(key, 6)

    x = jax.random.normal(kx, (B, N, Cin), dtype=jnp.float32)

    # Deterministic graphs: self-loops + ring of hop (b+1).  Self-loops guarantee
    # every destination has an in-neighbor (nonzero softmax denominator).
    dst = np.arange(N)
    adj_np = np.zeros((B, N, N), dtype=np.float32)
    for b in range(B):
        hop = b + 1
        adj_np[b, dst, dst] = 1.0
        adj_np[b, dst, (dst - hop) % N] = 1.0
        adj_np[b, dst, (dst + hop) % N] = 1.0
    adj = jnp.asarray(adj_np)

    # Xavier-normal-style init (gain=1.414), deterministic.  Weights stored
    # transposed relative to torch nn.Linear, i.e. (in, out) for x @ W.
    gain = 1.414
    std_fc = gain * np.sqrt(2.0 / (Cin + Cout))
    std_at = gain * np.sqrt(2.0 / (Cout + A))
    w_fc = std_fc * jax.random.normal(kfc, (H, Cin, Cout), dtype=jnp.float32)
    w_l = std_at * jax.random.normal(kl, (H, Cout, A), dtype=jnp.float32)
    w_r = std_at * jax.random.normal(kr, (H, Cout, A), dtype=jnp.float32)

    # Non-trivial BatchNorm affine parameters.
    gamma = 1.0 + 0.1 * jax.random.normal(kg, (1, Cin), dtype=jnp.float32)
    beta = 0.1 * jax.random.normal(kb, (1, Cin), dtype=jnp.float32)

    out = nas_layer_forward(x, adj, gamma, beta, w_fc, w_l, w_r)
    out = jax.block_until_ready(out)

    ref = reference_forward(x, adj, gamma, beta, w_fc, w_l, w_r)
    # Error budget: Newton-refined reciprocal ~1e-5 rel + f32 matmul reassociation
    # ~1e-6; 1e-3 tolerance leaves ~2 orders of magnitude of margin.
    np.testing.assert_allclose(np.asarray(out), np.asarray(ref),
                               rtol=1e-3, atol=1e-3)

    assert out.shape == (B, N, H * Cout)
    print("KERNEL_OK")
</pallas_src>

<mosaic_0001>
module attributes {stable_mosaic.version = 11 : i64} {
  func.func @nas_layer_kernel(%arg0: i32, %arg1: memref<1x128x16xf32, #tpu.memory_space<vmem>>, %arg2: memref<1x16xf32, #tpu.memory_space<vmem>>, %arg3: memref<1x16xf32, #tpu.memory_space<vmem>>, %arg4: memref<1x128x128xbf16, #tpu.memory_space<vmem>>, %arg5: memref<16x36xf32, #tpu.memory_space<vmem>>, %arg6: memref<1x36xf32, #tpu.memory_space<vmem>>, %arg7: memref<1x128x16xf32, #tpu.memory_space<vmem>>) attributes {dimension_semantics = [#tpu.dimension_semantics<parallel>], iteration_bounds = array<i64: 2>, scalar_prefetch = 0 : i64, scratch_operands = 0 : i64, tpu.core_type = #tpu.core_type<tc>, window_params = [{transform_indices = @transform_0, window_bounds = array<i64: 1, 128, 16>}, {pipeline_mode = #tpu.pipeline_mode<synchronous>, transform_indices = @transform_1, window_bounds = array<i64: 1, 16>}, {pipeline_mode = #tpu.pipeline_mode<synchronous>, transform_indices = @transform_2, window_bounds = array<i64: 1, 16>}, {transform_indices = @transform_3, window_bounds = array<i64: 1, 128, 128>}, {pipeline_mode = #tpu.pipeline_mode<synchronous>, transform_indices = @transform_4, window_bounds = array<i64: 16, 36>}, {pipeline_mode = #tpu.pipeline_mode<synchronous>, transform_indices = @transform_5, window_bounds = array<i64: 1, 36>}, {transform_indices = @transform_6, window_bounds = array<i64: 1, 128, 16>}]} {
    %c0 = arith.constant 0 : index
    %c0_0 = arith.constant 0 : index
    %c0_1 = arith.constant 0 : index
    %0 = vector.load %arg1[%c0, %c0_0, %c0_1] : memref<1x128x16xf32, #tpu.memory_space<vmem>>, vector<1x128x16xf32>
    %1 = vector.shape_cast %0 : vector<1x128x16xf32> to vector<128x16xf32>
    %cst = arith.constant dense<0.000000e+00> : vector<16xf32>
    %2 = vector.multi_reduction <add>, %1, %cst [0] : vector<128x16xf32> to vector<16xf32>
    %3 = vector.shape_cast %2 : vector<16xf32> to vector<1x16xf32>
    %cst_2 = arith.constant 1.280000e+02 : f32
    %4 = vector.broadcast %cst_2 : f32 to vector<1x16xf32>
    %5 = arith.divf %3, %4 : vector<1x16xf32>
    %6 = vector.broadcast %5 : vector<1x16xf32> to vector<128x16xf32>
    %7 = arith.subf %1, %6 : vector<128x16xf32>
    %8 = arith.mulf %7, %7 : vector<128x16xf32>
    %cst_3 = arith.constant dense<0.000000e+00> : vector<16xf32>
    %9 = vector.multi_reduction <add>, %8, %cst_3 [0] : vector<128x16xf32> to vector<16xf32>
    %10 = vector.shape_cast %9 : vector<16xf32> to vector<1x16xf32>
    %cst_4 = arith.constant 1.280000e+02 : f32
    %11 = vector.broadcast %cst_4 : f32 to vector<1x16xf32>
    %12 = arith.divf %10, %11 : vector<1x16xf32>
    %cst_5 = arith.constant 9.99999974E-6 : f32
    %13 = vector.broadcast %cst_5 : f32 to vector<1x16xf32>
    %14 = arith.addf %12, %13 : vector<1x16xf32>
    %15 = math.rsqrt %14 : vector<1x16xf32>
    %16 = vector.broadcast %5 : vector<1x16xf32> to vector<128x16xf32>
    %17 = arith.subf %1, %16 : vector<128x16xf32>
    %c0_6 = arith.constant 0 : index
    %c0_7 = arith.constant 0 : index
    %18 = vector.load %arg2[%c0_6, %c0_7] : memref<1x16xf32, #tpu.memory_space<vmem>>, vector<1x16xf32>
    %19 = arith.mulf %18, %15 : vector<1x16xf32>
    %20 = vector.broadcast %19 : vector<1x16xf32> to vector<128x16xf32>
    %21 = arith.mulf %17, %20 : vector<128x16xf32>
    %c0_8 = arith.constant 0 : index
    %c0_9 = arith.constant 0 : index
    %22 = vector.load %arg3[%c0_8, %c0_9] : memref<1x16xf32, #tpu.memory_space<vmem>>, vector<1x16xf32>
    %23 = vector.broadcast %22 : vector<1x16xf32> to vector<128x16xf32>
    %24 = arith.addf %21, %23 : vector<128x16xf32>
    %c0_10 = arith.constant 0 : index
    %c0_11 = arith.constant 0 : index
    %25 = vector.load %arg5[%c0_10, %c0_11] : memref<16x36xf32, #tpu.memory_space<vmem>>, vector<16x36xf32>
    %cst_12 = arith.constant dense<0.000000e+00> : vector<128x36xf32>
    %26 = tpu.matmul %24, %25, %cst_12 {dimension_numbers = #tpu.dot_dimension_numbers<[1], [0], [0], [1], [0, 0, 1, 1], [], []>} : vector<128x16xf32>, vector<16x36xf32>, vector<128x36xf32> -> vector<128x36xf32>
    %c0_13 = arith.constant 0 : index
    %c0_14 = arith.constant 0 : index
    %27 = vector.load %arg6[%c0_13, %c0_14] : memref<1x36xf32, #tpu.memory_space<vmem>>, vector<1x36xf32>
    %28 = vector.broadcast %27 : vector<1x36xf32> to vector<128x36xf32>
    %29 = arith.addf %26, %28 : vector<128x36xf32>
    %c0_15 = arith.constant 0 : index
    %c0_16 = arith.constant 0 : index
    %c0_17 = arith.constant 0 : index
    %30 = vector.load %arg4[%c0_15, %c0_16, %c0_17] : memref<1x128x128xbf16, #tpu.memory_space<vmem>>, vector<1x128x128xbf16>
    %31 = vector.shape_cast %30 : vector<1x128x128xbf16> to vector<128x128xbf16>
    %32 = arith.extf %31 : vector<128x128xbf16> to vector<128x128xf32>
    %33 = vector.extract_strided_slice %29 {offsets = [0, 32], sizes = [128, 2], strides = [1, 1]} : vector<128x36xf32> to vector<128x2xf32>
    %34 = vector.extract_strided_slice %29 {offsets = [0, 34], sizes = [128, 2], strides = [1, 1]} : vector<128x36xf32> to vector<128x2xf32>
    %35 = tpu.transpose %34, [1, 0] : vector<128x2xf32> -> vector<2x128xf32>
    %36 = vector.extract_strided_slice %33 {offsets = [0, 0], sizes = [128, 1], strides = [1, 1]} : vector<128x2xf32> to vector<128x1xf32>
    %37 = vector.extract_strided_slice %35 {offsets = [0, 0], sizes = [1, 128], strides = [1, 1]} : vector<2x128xf32> to vector<1x128xf32>
    %38 = vector.broadcast %36 : vector<128x1xf32> to vector<128x128xf32>
    %39 = vector.broadcast %37 : vector<1x128xf32> to vector<128x128xf32>
    %40 = arith.addf %38, %39 : vector<128x128xf32>
    %cst_18 = arith.constant 0.00999999977 : f32
    %41 = vector.broadcast %cst_18 : f32 to vector<128x128xf32>
    %42 = arith.mulf %41, %40 : vector<128x128xf32>
    %43 = arith.maximumf %40, %42 : vector<128x128xf32>
    %44 = arith.addf %43, %32 : vector<128x128xf32>
    %cst_19 = arith.constant dense<0xFF800000> : vector<128xf32>
    %45 = vector.multi_reduction <maximumf>, %44, %cst_19 [1] : vector<128x128xf32> to vector<128xf32>
    %46 = vector.shape_cast %45 : vector<128xf32> to vector<128x1xf32>
    %47 = vector.broadcast %46 : vector<128x1xf32> to vector<128x128xf32>
    %48 = arith.subf %44, %47 : vector<128x128xf32>
    %49 = math.exp %48 : vector<128x128xf32>
    %50 = vector.extract_strided_slice %29 {offsets = [0, 0], sizes = [128, 16], strides = [1, 1]} : vector<128x36xf32> to vector<128x16xf32>
    %cst_20 = arith.constant dense<0.000000e+00> : vector<128x16xf32>
    %51 = tpu.matmul %49, %50, %cst_20 {dimension_numbers = #tpu.dot_dimension_numbers<[1], [0], [0], [1], [0, 0, 1, 1], [], []>} : vector<128x128xf32>, vector<128x16xf32>, vector<128x16xf32> -> vector<128x16xf32>
    %52 = vector.extract_strided_slice %51 {offsets = [0, 0], sizes = [128, 8], strides = [1, 1]} : vector<128x16xf32> to vector<128x8xf32>
    %53 = vector.extract_strided_slice %51 {offsets = [0, 8], sizes = [128, 1], strides = [1, 1]} : vector<128x16xf32> to vector<128x1xf32>
    %54 = tpu.reciprocal %53 {approx = true} : vector<128x1xf32> -> vector<128x1xf32>
    %55 = arith.mulf %53, %54 : vector<128x1xf32>
    %cst_21 = arith.constant 2.000000e+00 : f32
    %56 = vector.broadcast %cst_21 : f32 to vector<128x1xf32>
    %57 = arith.subf %56, %55 : vector<128x1xf32>
    %58 = arith.mulf %54, %57 : vector<128x1xf32>
    %59 = vector.broadcast %58 : vector<128x1xf32> to vector<128x8xf32>
    %60 = arith.mulf %52, %59 : vector<128x8xf32>
    %cst_22 = arith.constant 0.000000e+00 : f32
    %61 = vector.broadcast %cst_22 : f32 to vector<128x8xf32>
    %62 = arith.maximumf %60, %61 : vector<128x8xf32>
    %63 = vector.extract_strided_slice %33 {offsets = [0, 1], sizes = [128, 1], strides = [1, 1]} : vector<128x2xf32> to vector<128x1xf32>
    %64 = vector.extract_strided_slice %35 {offsets = [1, 0], sizes = [1, 128], strides = [1, 1]} : vector<2x128xf32> to vector<1x128xf32>
    %65 = vector.broadcast %63 : vector<128x1xf32> to vector<128x128xf32>
    %66 = vector.broadcast %64 : vector<1x128xf32> to vector<128x128xf32>
    %67 = arith.addf %65, %66 : vector<128x128xf32>
    %cst_23 = arith.constant 0.00999999977 : f32
    %68 = vector.broadcast %cst_23 : f32 to vector<128x128xf32>
    %69 = arith.mulf %68, %67 : vector<128x128xf32>
    %70 = arith.maximumf %67, %69 : vector<128x128xf32>
    %71 = arith.addf %70, %32 : vector<128x128xf32>
    %cst_24 = arith.constant dense<0xFF800000> : vector<128xf32>
    %72 = vector.multi_reduction <maximumf>, %71, %cst_24 [1] : vector<128x128xf32> to vector<128xf32>
    %73 = vector.shape_cast %72 : vector<128xf32> to vector<128x1xf32>
    %74 = vector.broadcast %73 : vector<128x1xf32> to vector<128x128xf32>
    %75 = arith.subf %71, %74 : vector<128x128xf32>
    %76 = math.exp %75 : vector<128x128xf32>
    %77 = vector.extract_strided_slice %29 {offsets = [0, 16], sizes = [128, 16], strides = [1, 1]} : vector<128x36xf32> to vector<128x16xf32>
    %cst_25 = arith.constant dense<0.000000e+00> : vector<128x16xf32>
    %78 = tpu.matmul %76, %77, %cst_25 {dimension_numbers = #tpu.dot_dimension_numbers<[1], [0], [0], [1], [0, 0, 1, 1], [], []>} : vector<128x128xf32>, vector<128x16xf32>, vector<128x16xf32> -> vector<128x16xf32>
    %79 = vector.extract_strided_slice %78 {offsets = [0, 0], sizes = [128, 8], strides = [1, 1]} : vector<128x16xf32> to vector<128x8xf32>
    %80 = vector.extract_strided_slice %78 {offsets = [0, 8], sizes = [128, 1], strides = [1, 1]} : vector<128x16xf32> to vector<128x1xf32>
    %81 = tpu.reciprocal %80 {approx = true} : vector<128x1xf32> -> vector<128x1xf32>
    %82 = arith.mulf %80, %81 : vector<128x1xf32>
    %cst_26 = arith.constant 2.000000e+00 : f32
    %83 = vector.broadcast %cst_26 : f32 to vector<128x1xf32>
    %84 = arith.subf %83, %82 : vector<128x1xf32>
    %85 = arith.mulf %81, %84 : vector<128x1xf32>
    %86 = vector.broadcast %85 : vector<128x1xf32> to vector<128x8xf32>
    %87 = arith.mulf %79, %86 : vector<128x8xf32>
    %cst_27 = arith.constant 0.000000e+00 : f32
    %88 = vector.broadcast %cst_27 : f32 to vector<128x8xf32>
    %89 = arith.maximumf %87, %88 : vector<128x8xf32>
    %90 = tpu.concatenate %62, %89 in 1 : vector<128x8xf32>, vector<128x8xf32> -> vector<128x16xf32>
    %c0_28 = arith.constant 0 : index
    %c0_29 = arith.constant 0 : index
    %c0_30 = arith.constant 0 : index
    %91 = vector.load %arg7[%c0_28, %c0_29, %c0_30] : memref<1x128x16xf32, #tpu.memory_space<vmem>>, vector<1x128x16xf32>
    %92 = vector.shape_cast %91 : vector<1x128x16xf32> to vector<128x16xf32>
    %93 = vector.shape_cast %90 : vector<128x16xf32> to vector<1x128x16xf32>
    tpu.vector_store %arg7[%c0_28, %c0_29, %c0_30], %93 {strides = array<i32>} : memref<1x128x16xf32, #tpu.memory_space<vmem>>, vector<1x128x16xf32>,
    return
  }
  func.func @transform_0(%arg0: i32) -> (i32, i32, i32) {
    %c0_i32 = arith.constant 0 : i32
    %c0_i32_0 = arith.constant 0 : i32
    %c0_i32_1 = arith.constant 0 : i32
    return %arg0, %c0_i32, %c0_i32_0 : i32, i32, i32
  }
  func.func @transform_1(%arg0: i32) -> (i32, i32) {
    %c0_i32 = arith.constant 0 : i32
    %c0_i32_0 = arith.constant 0 : i32
    %c0_i32_1 = arith.constant 0 : i32
    return %c0_i32, %c0_i32_0 : i32, i32
  }
  func.func @transform_2(%arg0: i32) -> (i32, i32) {
    %c0_i32 = arith.constant 0 : i32
    %c0_i32_0 = arith.constant 0 : i32
    %c0_i32_1 = arith.constant 0 : i32
    return %c0_i32, %c0_i32_0 : i32, i32
  }
  func.func @transform_3(%arg0: i32) -> (i32, i32, i32) {
    %c0_i32 = arith.constant 0 : i32
    %c0_i32_0 = arith.constant 0 : i32
    %c0_i32_1 = arith.constant 0 : i32
    return %arg0, %c0_i32, %c0_i32_0 : i32, i32, i32
  }
  func.func @transform_4(%arg0: i32) -> (i32, i32) {
    %c0_i32 = arith.constant 0 : i32
    %c0_i32_0 = arith.constant 0 : i32
    %c0_i32_1 = arith.constant 0 : i32
    return %c0_i32, %c0_i32_0 : i32, i32
  }
  func.func @transform_5(%arg0: i32) -> (i32, i32) {
    %c0_i32 = arith.constant 0 : i32
    %c0_i32_0 = arith.constant 0 : i32
    %c0_i32_1 = arith.constant 0 : i32
    return %c0_i32, %c0_i32_0 : i32, i32
  }
  func.func @transform_6(%arg0: i32) -> (i32, i32, i32) {
    %c0_i32 = arith.constant 0 : i32
    %c0_i32_0 = arith.constant 0 : i32
    %c0_i32_1 = arith.constant 0 : i32
    return %arg0, %c0_i32, %c0_i32_0 : i32, i32, i32
  }
}

</mosaic_0001>

<bundles_post_ra>
// kernel: tpu_custom_call.1
= control target key start
LH: loop header
LB: loop body
LE: loop exit
PB: predicated region body
PF: predicated region fallthrough
CT: control target
= control target key end

     0   :  { %s2180_s21 = smov 0   ;;  %s3257_s0 = inlined_call_operand.vmem [shape: f32[2,128,16], index: 0, kind: input, shape index: {}]   ;;  %s3258_s1 = inlined_call_operand.vmem [shape: f32[1,16], index: 1, kind: input, shape index: {}]   ;;  %s3259_s2 = inlined_call_operand.vmem [shape: f32[1,16], index: 2, kind: input, shape index: {}]   ;;  %s3260_s3 = inlined_call_operand.vmem [shape: bf16[2,128,128], index: 3, kind: input, shape index: {}]   ;;  %s3261_s4 = inlined_call_operand.vmem [shape: f32[16,36], index: 4, kind: input, shape index: {}]   ;;  %s3262_s5 = inlined_call_operand.vmem [shape: f32[1,36], index: 5, kind: input, shape index: {}]   ;;  %s3263_s6 = inlined_call_operand.vmem [shape: f32[2,128,16], index: 6, kind: output, shape index: {}]  }
   0x1 LB: > { %s1815_s22 = sadd.s32 4294967295, %s2136_s21   ;;  %p1819_p0 = scmp.ge.s32.totalorder %s2136_s21, 1  ;;  %s2136_s21 = sphi %s2180_s21, %s16_s21  }
   0x2   : > { %p222_p1 = scmp.lt.s32.totalorder %s2136_s21, 3 }
   0x4   : > { %p223_p2 = pnand %p1819_p0, %p222_p1 }
   0x5   : > { %p257_p3 = scmp.lt.s32.totalorder (!%p223_p2), %s1815_s22, 1  ;;  %s2141_s13 = smov (!%p223_p2), 94  }
   0x6   : > { %226 = sbr.rel (%p223_p2) target bundleno = 1340 (0x53c), region = 44  ;;  %s2142_s14 = smov (!%p223_p2), 112  }
   0x7   : > { %s2144_s19 = smov (!%p223_p2), 8  }
   0xb   : > { %v457_v0 = vld [vmem:[%s3261_s4 + $0x8] sm:$0xff]  ;;  %v456_v1 = vld [vmem:[%s3261_s4] sm:$0xff]  ;;  %s3269_s22 = smov (!%p257_p3, %s1815_s22), 1  ;;  %vm288_vm0 = vcmask 130048   ;;  %v2138_v32 = vmov 128.0   ;;  %vm1715_vm5 = vcmask 64512  }
   0xc   : > { %524 = vmatpush.msra.mxu0 %v457_v0  ;;  %s1844_s27 = sshll.u32 %s3269_s22, 7  ;;  %1998 = vrcp.f32 %v2138_v32  ;;  %s1845_s15 = sshll.u32 %s3269_s22, 6 }
   0xd   : > { %s2202_s30 = scalar_lea.vmem %s3257_s0, %s1844_s27  ;;  %s2662_s18 = scalar_lea.vmem %s3260_s3, %s1845_s15 }
   0xe   : > { %525 = vmatpush.msra.mxu0 %v456_v1  ;;  %v2205_v2 = vld [vmem:[%s2202_s30] sm:$0xff]  ;;  %v2208_v3 = vld [vmem:[%s2202_s30 + $0x8] sm:$0xff]  ;;  %v2211_v4 = vld [vmem:[%s2202_s30 + $0x10] sm:$0xff]  ;;  %s3172_s24 = scalar_lea.vmem %s3263_s6, %s1844_s27 }
   0xf   : > { %v2214_v5 = vld [vmem:[%s2202_s30 + $0x18] sm:$0xff]  ;;  %v289_v6 = vsel %vm288_vm0, %v2205_v2, 0.0  ;;  %v290_v7 = vsel %vm288_vm0, %v2208_v3, 0.0  ;;  %v292_v8 = vsel %vm288_vm0, %v2211_v4, 0.0  ;;  %v276_v9 = vld [vmem:[%s2202_s30 + $0x20] sm:$0xff]  ;;  %v277_v12 = vld [vmem:[%s2202_s30 + $0x28] sm:$0xff] }
  0x10   : > { %v291_v10 = vadd.f32 %v290_v7, %v289_v6  ;;  %v294_v11 = vsel %vm288_vm0, %v2214_v5, 0.0  ;;  %v296_v14 = vsel %vm288_vm0, %v276_v9, 0.0  ;;  %v278_v15 = vld [vmem:[%s2202_s30 + $0x30] sm:$0xff]  ;;  %v298_v17 = vsel %vm288_vm0, %v277_v12, 0.0  ;;  %v2230_v18 = vld [vmem:[%s2202_s30 + $0x38] sm:$0xff]  ;;  %v2234_v21 = vld [vmem:[%s2202_s30 + $0x40] sm:$0xff] }
  0x11   : > { %v300_v20 = vsel %vm288_vm0, %v278_v15, 0.0  ;;  %v302_v23 = vsel %vm288_vm0, %v2230_v18, 0.0  ;;  %v2239_v24 = vld [vmem:[%s2202_s30 + $0x48] sm:$0xff]  ;;  %v304_v26 = vsel %vm288_vm0, %v2234_v21, 0.0  ;;  %v2244_v27 = vld [vmem:[%s2202_s30 + $0x50] sm:$0xff]  ;;  %v2249_v30 = vld [vmem:[%s2202_s30 + $0x58] sm:$0xff] }
  0x12   : > { %v293_v13 = vadd.f32 %v292_v8, %v291_v10  ;;  %v306_v29 = vsel %vm288_vm0, %v2239_v24, 0.0  ;;  %v308_v33 = vsel %vm288_vm0, %v2244_v27, 0.0  ;;  %v2254_v34 = vld [vmem:[%s2202_s30 + $0x60] sm:$0xff]  ;;  %v310_v36 = vsel %vm288_vm0, %v2249_v30, 0.0  ;;  %v2259_v37 = vld [vmem:[%s2202_s30 + $0x68] sm:$0xff]  ;;  %v1999_v40 = vpop.eup %1998  ;;  %v2264_v41 = vld [vmem:[%s2202_s30 + $0x70] sm:$0xff] }
  0x13   : > { %v312_v39 = vsel %vm288_vm0, %v2254_v34, 0.0  ;;  %v314_v43 = vsel %vm288_vm0, %v2259_v37, 0.0  ;;  %v2269_v44 = vld [vmem:[%s2202_s30 + $0x78] sm:$0xff]  ;;  %v316_v46 = vsel %vm288_vm0, %v2264_v41, 0.0  ;;  %v327_v47 = vmul.f32 128.0, %v1999_v40 }
  0x14   : > { %v295_v16 = vadd.f32 %v294_v11, %v293_v13  ;;  %v318_v49 = vsel %vm288_vm0, %v2269_v44, 0.0  ;;  %vm331_vm1 = vweird.f32 %v1999_v40 }
  0x15   : > { %v328_v51 = vsub.f32 1.0, %v327_v47 }
  0x16   : > { %v297_v19 = vadd.f32 %v296_v14, %v295_v16 }
  0x17   : > { %v329_v54 = vmul.f32 %v1999_v40, %v328_v51 }
  0x18   : > { %v299_v22 = vadd.f32 %v298_v17, %v297_v19 }
  0x19   : > { %v330_v57 = vadd.f32 %v1999_v40, %v329_v54 }
  0x1a   : > { %v301_v25 = vadd.f32 %v300_v20, %v299_v22 }
  0x1b   : > { %v2275_v60 = vsel %vm331_vm1, %v1999_v40, %v330_v57 }
  0x1c   : > { %v303_v28 = vadd.f32 %v302_v23, %v301_v25 }
  0x1e   : > { %v305_v31 = vadd.f32 %v304_v26, %v303_v28 }
  0x20   : > { %v307_v35 = vadd.f32 %v306_v29, %v305_v31 }
  0x22   : > { %v309_v38 = vadd.f32 %v308_v33, %v307_v35 }
  0x24   : > { %v311_v42 = vadd.f32 %v310_v36, %v309_v38 }
  0x26   : > { %v313_v45 = vadd.f32 %v312_v39, %v311_v42 }
  0x28   : > { %v315_v48 = vadd.f32 %v314_v43, %v313_v45 }
  0x2a   : > { %v317_v50 = vadd.f32 %v316_v46, %v315_v48 }
  0x2c   : > { %v319_v52 = vadd.f32 %v318_v49, %v317_v50 }
  0x2e   : > { %v320_v53 = vrot.slane %v319_v52, 4 }
  0x30   : > { %v321_v55 = vadd.f32 %v320_v53, %v319_v52 }
  0x32   : > { %v322_v56 = vrot.slane %v321_v55, 2 }
  0x34   : > { %v323_v58 = vadd.f32 %v322_v56, %v321_v55 }
  0x36   : > { %v324_v59 = vrot.slane %v323_v58, 1 }
  0x38   : > { %v325_v61 = vadd.f32 %v324_v59, %v323_v58 }
  0x3a   : > { %v333_v62 = vmul.f32 %v2275_v60, %v325_v61 }
  0x3c   : > { %v2279_v63 = vsub.f32 %v2205_v2, %v333_v62  ;;  %v2282_v0 = vsub.f32 %v2208_v3, %v333_v62  ;;  %v2285_v1 = vsub.f32 %v2211_v4, %v333_v62  ;;  %v2288_v6 = vsub.f32 %v2214_v5, %v333_v62 }
  0x3d   : > { %v2290_v7 = vsub.f32 %v276_v9, %v333_v62  ;;  %v2298_v11 = vsub.f32 %v277_v12, %v333_v62  ;;  %v2302_v4 = vsub.f32 %v278_v15, %v333_v62  ;;  %v2310_v17 = vsub.f32 %v2230_v18, %v333_v62 }
  0x3e   : > { %v350_v8 = vmul.f32 %v2279_v63, %v2279_v63  ;;  %v351_v10 = vmul.f32 %v2282_v0, %v2282_v0  ;;  %v352_v2 = vmul.f32 %v2285_v1, %v2285_v1  ;;  %v353_v3 = vmul.f32 %v2288_v6, %v2288_v6 }
  0x3f   : > { %v354_v5 = vmul.f32 %v2290_v7, %v2290_v7  ;;  %v355_v12 = vmul.f32 %v2298_v11, %v2298_v11  ;;  %v2316_v20 = vsub.f32 %v2234_v21, %v333_v62  ;;  %v356_v22 = vmul.f32 %v2302_v4, %v2302_v4 }
  0x40   : > { %v366_v9 = vsel %vm288_vm0, %v350_v8, 0.0  ;;  %v367_v13 = vsel %vm288_vm0, %v351_v10, 0.0  ;;  %v369_v14 = vsel %vm288_vm0, %v352_v2, 0.0  ;;  %v371_v19 = vsel %vm288_vm0, %v353_v3, 0.0 }
  0x41   : > { %v368_v16 = vadd.f32 %v367_v13, %v366_v9  ;;  %v373_v23 = vsel %vm288_vm0, %v354_v5, 0.0  ;;  %v2322_v26 = vsub.f32 %v2239_v24, %v333_v62  ;;  %v357_v18 = vmul.f32 %v2310_v17, %v2310_v17 }
  0x42   : > { %v375_v28 = vsel %vm288_vm0, %v355_v12, 0.0  ;;  %v2328_v31 = vsub.f32 %v2244_v27, %v333_v62  ;;  %v358_v21 = vmul.f32 %v2316_v20, %v2316_v20  ;;  %v377_v32 = vsel %vm288_vm0, %v356_v22, 0.0 }
  0x43   : > { %v370_v15 = vadd.f32 %v369_v14, %v368_v16  ;;  %v2334_v35 = vsub.f32 %v2249_v30, %v333_v62  ;;  %v359_v24 = vmul.f32 %v2322_v26, %v2322_v26  ;;  %v379_v36 = vsel %vm288_vm0, %v357_v18, 0.0 }
  0x44   : > { %v2340_v39 = vsub.f32 %v2254_v34, %v333_v62  ;;  %v360_v27 = vmul.f32 %v2328_v31, %v2328_v31  ;;  %v381_v40 = vsel %vm288_vm0, %v358_v21, 0.0  ;;  %v2346_v43 = vsub.f32 %v2259_v37, %v333_v62 }
  0x45   : > { %v372_v25 = vadd.f32 %v371_v19, %v370_v15  ;;  %v361_v30 = vmul.f32 %v2334_v35, %v2334_v35  ;;  %v383_v45 = vsel %vm288_vm0, %v359_v24, 0.0  ;;  %v2352_v47 = vsub.f32 %v2264_v41, %v333_v62 }
  0x46   : > { %v362_v34 = vmul.f32 %v2340_v39, %v2340_v39  ;;  %v385_v48 = vsel %vm288_vm0, %v360_v27, 0.0  ;;  %v2358_v50 = vsub.f32 %v2269_v44, %v333_v62  ;;  %v363_v37 = vmul.f32 %v2346_v43, %v2346_v43 }
  0x47   : > { %v374_v29 = vadd.f32 %v373_v23, %v372_v25  ;;  %v387_v51 = vsel %vm288_vm0, %v361_v30, 0.0  ;;  %v364_v53 = vmul.f32 %v2352_v47, %v2352_v47  ;;  %v415_v25 = vld [vmem:[%s3258_s1] sm:$0x1] }
  0x48   : > { %v389_v41 = vsel %vm288_vm0, %v362_v34, 0.0  ;;  %v365_v55 = vmul.f32 %v2358_v50, %v2358_v50  ;;  %v391_v56 = vsel %vm288_vm0, %v363_v37, 0.0 }
  0x49   : > { %v376_v33 = vadd.f32 %v375_v28, %v374_v29  ;;  %v393_v44 = vsel %vm288_vm0, %v364_v53, 0.0 }
  0x4a   : > { %v395_v59 = vsel %vm288_vm0, %v365_v55, 0.0 }
  0x4b   : > { %v378_v38 = vadd.f32 %v377_v32, %v376_v33 }
  0x4d   : > { %v380_v42 = vadd.f32 %v379_v36, %v378_v38 }
  0x4f   : > { %v382_v46 = vadd.f32 %v381_v40, %v380_v42 }
  0x51   : > { %v384_v49 = vadd.f32 %v383_v45, %v382_v46 }
  0x53   : > { %v386_v52 = vadd.f32 %v385_v48, %v384_v49 }
  0x55   : > { %v388_v54 = vadd.f32 %v387_v51, %v386_v52  ;;  %v2139_v52 = vmov 32  }
  0x56   : > { %1933 = vset.pattern.permute.xlu2 %v2139_v52 }
  0x57   : > { %v390_v57 = vadd.f32 %v389_v41, %v388_v54 }
  0x59   : > { %v392_v58 = vadd.f32 %v391_v56, %v390_v57 }
  0x5b   : > { %v394_v61 = vadd.f32 %v393_v44, %v392_v58 }
  0x5d   : > { %v396_v62 = vadd.f32 %v395_v59, %v394_v61 }
  0x5f   : > { %v397_v8 = vrot.slane %v396_v62, 4 }
  0x61   : > { %v398_v10 = vadd.f32 %v397_v8, %v396_v62 }
  0x63   : > { %v399_v2 = vrot.slane %v398_v10, 2 }
  0x65   : > { %v400_v3 = vadd.f32 %v399_v2, %v398_v10 }
  0x67   : > { %v401_v5 = vrot.slane %v400_v3, 1 }
  0x69   : > { %v402_v9 = vadd.f32 %v401_v5, %v400_v3 }
  0x6b   : > { %v403_v13 = vmul.f32 %v402_v9, %v2275_v60  ;;  %v1996_v60 = vld [vmem:[%s3259_s2] ss:$0 sm:$0xff] }
  0x6d   : > { %v404_v14 = vadd.f32 1e-05, %v403_v13 }
  0x6f   : > { %2000 = vrsqrt.f32 %v404_v14  ;;  %vm411_vm2 = vweird.f32 %v404_v14 }
  0x75   : > { %v2001_v16 = vpop.eup %2000 }
  0x76   : > { %v406_v12 = vmul.f32 %v2001_v16, %v404_v14  ;;  %vm412_vm3 = vweird.f32 %v2001_v16 }
  0x77   : > { %vm413_vm4 = vmor %vm411_vm2, %vm412_vm3 }
  0x78   : > { %v407_v19 = vmul.f32 %v2001_v16, %v406_v12 }
  0x7a   : > { %v408_v15 = vmul.f32 0.5, %v407_v19 }
  0x7c   : > { %v409_v22 = vsub.f32 1.5, %v408_v15 }
  0x7e   : > { %v410_v23 = vmul.f32 %v2001_v16, %v409_v22 }
  0x80   : > { %v414_v18 = vsel %vm413_vm4, %v2001_v16, %v410_v23 }
  0x81   : > { %v416_v28 = vmul.f32 %v415_v25, %v414_v18 }
  0x83   : > { %v418_v29 = vperm.slane %v416_v28, 0 }
  0x85   : > { %v420_v21 = vmul.f32 %v418_v29, %v2279_v63  ;;  %v421_v33 = vmul.f32 %v418_v29, %v2282_v0  ;;  %v422_v36 = vmul.f32 %v418_v29, %v2285_v1  ;;  %v423_v27 = vmul.f32 %v418_v29, %v2288_v6 }
  0x86   : > { %v424_v63 = vmul.f32 %v418_v29, %v2290_v7  ;;  %v425_v0 = vmul.f32 %v418_v29, %v2298_v11  ;;  %v426_v1 = vmul.f32 %v418_v29, %v2302_v4  ;;  %v427_v6 = vmul.f32 %v418_v29, %v2310_v17 }
  0x87   : > { %v440_v32 = vadd.f32 %v1996_v60, %v420_v21  ;;  %v441_v24 = vadd.f32 %v1996_v60, %v421_v33  ;;  %v442_v38 = vadd.f32 %v1996_v60, %v422_v36  ;;  %v443_v40 = vadd.f32 %v1996_v60, %v423_v27 }
  0x88   : > { %v444_v42 = vadd.f32 %v1996_v60, %v424_v63  ;;  %v445_v30 = vadd.f32 %v1996_v60, %v425_v0  ;;  %v446_v45 = vadd.f32 %v1996_v60, %v426_v1  ;;  %v447_v46 = vadd.f32 %v1996_v60, %v427_v6 }
  0x89   : > { %1826 = vmatmul.msk.f32.vlgmr.msra.gmra.mxu0 %vm288_vm0, %v440_v32  ;;  %v428_v7 = vmul.f32 %v418_v29, %v2316_v20  ;;  %v429_v11 = vmul.f32 %v418_v29, %v2322_v26  ;;  %v430_v4 = vmul.f32 %v418_v29, %v2328_v31  ;;  %v431_v17 = vmul.f32 %v418_v29, %v2334_v35 }
  0x8a   : > { %v432_v20 = vmul.f32 %v418_v29, %v2340_v39  ;;  %v433_v26 = vmul.f32 %v418_v29, %v2346_v43  ;;  %v2140_v31 = vmov 33   ;;  %v434_v35 = vmul.f32 %v418_v29, %v2352_v47  ;;  %v2416_v43 = vld [vmem:[%s3262_s5] ss:$0 sm:$0xff] }
  0x8b   : > { %v448_v34 = vadd.f32 %v1996_v60, %v428_v7  ;;  %v449_v48 = vadd.f32 %v1996_v60, %v429_v11  ;;  %v450_v49 = vadd.f32 %v1996_v60, %v430_v4  ;;  %v451_v37 = vadd.f32 %v1996_v60, %v431_v17  ;;  %1934 = vset.pattern.permute.xlu0 %v2140_v31 }
  0x8c   : > { %v452_v51 = vadd.f32 %v1996_v60, %v432_v20  ;;  %v453_v53 = vadd.f32 %v1996_v60, %v433_v26  ;;  %1967 = vset.pattern.permute.xlu1 %v2140_v31  ;;  %v454_v41 = vadd.f32 %v1996_v60, %v434_v35  ;;  %v435_v39 = vmul.f32 %v418_v29, %v2358_v50 }
  0x8e   : > { %v455_v54 = vadd.f32 %v1996_v60, %v435_v39 }
  0x91   : > { %1827 = vmatmul.msk.f32.gmra.mxu0 %vm288_vm0, %v441_v24 }
  0x99   : > { %1828 = vmatmul.msk.f32.gmra.mxu0 %vm288_vm0, %v442_v38 }
  0xa1   : > { %1829 = vmatmul.msk.f32.gmra.mxu0 %vm288_vm0, %v443_v40 }
  0xa9   : > { %1830 = vmatmul.msk.f32.gmra.mxu0 %vm288_vm0, %v444_v42 }
  0xb1   : > { %1831 = vmatmul.msk.f32.gmra.mxu0 %vm288_vm0, %v445_v30 }
  0xb9   : > { %1832 = vmatmul.msk.f32.gmra.mxu0 %vm288_vm0, %v446_v45 }
  0xc1   : > { %1833 = vmatmul.msk.f32.gmra.mxu0 %vm288_vm0, %v447_v46 }
  0xc9   : > { %1834 = vmatmul.msk.f32.gmra.mxu0 %vm288_vm0, %v448_v34 }
  0xd1   : > { %1835 = vmatmul.msk.f32.gmra.mxu0 %vm288_vm0, %v449_v48 }
  0xd9   : > { %1836 = vmatmul.msk.f32.gmra.mxu0 %vm288_vm0, %v450_v49 }
  0xe1   : > { %1837 = vmatmul.msk.f32.gmra.mxu0 %vm288_vm0, %v451_v37 }
  0xe9   : > { %1838 = vmatmul.msk.f32.gmra.mxu0 %vm288_vm0, %v452_v51 }
  0xf1   : > { %1839 = vmatmul.msk.f32.gmra.mxu0 %vm288_vm0, %v453_v53 }
  0xf9   : > { %1840 = vmatmul.msk.f32.gmra.mxu0 %vm288_vm0, %v454_v41 }
 0x101   : > { %1841 = vmatmul.msk.f32.gmra.mxu0 %vm288_vm0, %v455_v54 }
 0x106   : > { %v527_v55 = vpop.f32.mrf.mxu0 }
 0x107   : > { %v2419_v56 = vadd.f32 %v2416_v43, %v527_v55 }
 0x109   : > { %704 = vperm.xlu2 %1933, %v2419_v56   ;;  %623 = vrot.lane.b32.xlu0 %v2419_v56, %s2141_s13 }
 0x10e   : > { %v530_v47 = vpop.f32.mrf.mxu0 }
 0x10f   : > { %v2425_v50 = vadd.f32 %v2416_v43, %v530_v47 }
 0x111   : > { %1936 = vset.pattern.permute.xlu2 %v2140_v31  ;;  %1154 = vperm.xlu0 %1934, %v2419_v56   ;;  %v1937_v58 = vpack.i.bf16 %v2419_v56, %v2425_v50 }
 0x112   : > { %1158 = vperm.xlu2 %1936, %v2425_v50  }
 0x116   : > { %v533_v57 = vpop.f32.mrf.mxu0 }
 0x117   : > { %v2431_v44 = vadd.f32 %v2416_v43, %v533_v57 }
 0x119   : > { %627 = vrot.lane.b32.xlu1 %v2431_v44, %s2141_s13  ;;  %625 = vrot.lane.b32.xlu0 %v2425_v50, %s2141_s13 }
 0x11a   : > { %1938 = vrot.lane.b32.xlu2 %v1937_v58, %s2142_s14  ;;  %1935 = vset.pattern.permute.xlu0 %v2139_v52 }
 0x11b   : > { %1942 = vset.pattern.permute.xlu2 %v2139_v52 }
 0x11e   : > { %v536_v59 = vpop.f32.mrf.mxu0 }
 0x11f   : > { %v2443_v61 = vadd.f32 %v2416_v43, %v536_v59 }
 0x121   : > { %629 = vrot.lane.b32.xlu1 %v2443_v61, %s2141_s13  ;;  %708 = vperm.xlu0 %1935, %v2425_v50   ;;  %v1945_v3 = vpack.i.bf16 %v2431_v44, %v2443_v61 }
 0x122   : > { %712 = vperm.xlu2 %1942, %v2431_v44  }
 0x126   : > { %v539_v62 = vpop.f32.mrf.mxu0 }
 0x127   : > { %v2453_v10 = vadd.f32 %v2416_v43, %v539_v62 }
 0x129   : > { %1943 = vset.pattern.permute.xlu0 %v2140_v31 }
 0x12a   : > { %716 = vperm.xlu2 %1942, %v2443_v61   ;;  %1162 = vperm.xlu0 %1943, %v2431_v44  }
 0x12e   : > { %v542_v8 = vpop.f32.mrf.mxu0 }
 0x12f   : > { %v2462_v5 = vadd.f32 %v2416_v43, %v542_v8 }
 0x131   : > { %v1953_v14 = vpack.i.bf16 %v2453_v10, %v2462_v5 }
 0x132   : > { %1944 = vset.pattern.permute.xlu2 %v2140_v31  ;;  %1950 = vset.pattern.permute.xlu0 %v2139_v52 }
 0x133   : > { %1166 = vperm.xlu2 %1944, %v2443_v61   ;;  %720 = vperm.xlu0 %1950, %v2453_v10  }
 0x136   : > { %v545_v2 = vpop.f32.mrf.mxu0 }
 0x137   : > { %v2483_v19 = vadd.f32 %v2416_v43, %v545_v2 }
 0x13b   : > { %1946 = vrot.lane.b32.xlu2 %v1945_v3, %s2142_s14  ;;  %1952 = vset.pattern.permute.xlu0 %v2140_v31 }
 0x13c   : > { %1174 = vperm.xlu0 %1952, %v2462_v5  }
 0x13e   : > { %v548_v9 = vpop.f32.mrf.mxu0 }
 0x13f   : > { %v2468_v13 = vadd.f32 %v2416_v43, %v548_v9 }
 0x141   : > { %637 = vrot.lane.b32.xlu1 %v2468_v13, %s2141_s13  ;;  %v1961_v25 = vpack.i.bf16 %v2483_v19, %v2468_v13 }
 0x143   : > { %631 = vrot.lane.b32.xlu2 %v2453_v10, %s2141_s13 }
 0x144   : > { %1954 = vrot.lane.b32.xlu0 %v1953_v14, %s2142_s14 }
 0x145   : > { %1958 = vset.pattern.permute.xlu0 %v2139_v52 }
 0x146   : > { %v551_v16 = vpop.f32.mrf.mxu0 }
 0x147   : > { %v2479_v12 = vadd.f32 %v2416_v43, %v551_v16 }
 0x149   : > { %1186 = vperm.xlu1 %1967, %v2479_v12  }
 0x14b   : > { %1170 = vperm.xlu2 %1944, %v2453_v10  }
 0x14c   : > { %635 = vrot.lane.b32.xlu0 %v2483_v19, %s2141_s13 }
 0x14e   : > { %v554_v15 = vpop.f32.mrf.mxu0 }
 0x14f   : > { %v2507_v60 = vadd.f32 %v2416_v43, %v554_v15 }
 0x151   : > { %v1969_v46 = vpack.i.bf16 %v2479_v12, %v2507_v60 }
 0x153   : > { %633 = vrot.lane.b32.xlu2 %v2462_v5, %s2141_s13 }
 0x154   : > { %728 = vperm.xlu0 %1958, %v2483_v19   ;;  %1951 = vset.pattern.permute.xlu2 %v2139_v52 }
 0x156   : > { %v557_v22 = vpop.f32.mrf.mxu0 }
 0x157   : > { %v2493_v23 = vadd.f32 %v2416_v43, %v557_v22 }
 0x159   : > { %643 = vrot.lane.b32.xlu1 %v2493_v23, %s2141_s13 }
 0x15b   : > { %724 = vperm.xlu2 %1951, %v2462_v5  }
 0x15c   : > { %1962 = vrot.lane.b32.xlu0 %v1961_v25, %s2142_s14 }
 0x15e   : > { %v560_v18 = vpop.f32.mrf.mxu0 }
 0x15f   : > { %v2552_v45 = vadd.f32 %v2416_v43, %v560_v18 }
 0x161   : > { %v1974_v17 = vpack.i.bf16 %v2493_v23, %v2552_v45 }
 0x163   : > { %1959 = vset.pattern.permute.xlu2 %v2140_v31  ;;  %v2502_v28 = vpop.permute.xlu2 %704 }
 0x164   : > { %1178 = vperm.xlu2 %1959, %v2483_v19   ;;  %736 = vperm.xlu0 %1958, %v2479_v12  }
 0x166   : > { %v563_v29 = vpop.f32.mrf.mxu0 }
 0x167   : > { %v564_v38 = vadd.f32 %v2416_v43, %v563_v29 }
 0x16c   : > { %1960 = vset.pattern.permute.xlu2 %v2139_v52  ;;  %v2510_v21 = vpop.permute.xlu2 %1158  ;;  %641 = vrot.lane.b32.xlu0 %v2507_v60, %s2141_s13 }
 0x16d   : > { %732 = vperm.xlu2 %1960, %v2468_v13  }
 0x16e   : > { %v566_v32 = vpop.f32.mrf.mxu0 }
 0x16f   : > { %v2516_v33 = vadd.f32 %v2416_v43, %v566_v32 }
 0x171   : > { %649 = vrot.lane.b32.xlu1 %v2516_v33, %s2141_s13  ;;  %v1980_v11 = vpack.i.bf16 %v564_v38, %v2516_v33 }
 0x174   : > { %v2520_v24 = vpop.permute.xlu2 %1938  ;;  %744 = vperm.xlu0 %1958, %v2493_v23  }
 0x175   : > { %1966 = vset.pattern.permute.xlu2 %v2140_v31 }
 0x176   : > { %v569_v36 = vpop.f32.mrf.mxu0  ;;  %1182 = vperm.xlu2 %1966, %v2468_v13  }
 0x177   : > { %v2534_v42 = vadd.f32 %v2416_v43, %v569_v36 }
 0x17b   : > { %v2526_v27 = vpop.permute.xlu0 %623 }
 0x17c   : > { %v2528_v40 = vpop.permute.xlu2 %712  ;;  %647 = vrot.lane.b32.xlu0 %v564_v38, %s2141_s13 }
 0x17e   : > { %v572_v63 = vpop.f32.mrf.mxu0  ;;  %639 = vrot.lane.b32.xlu2 %v2479_v12, %s2141_s13 }
 0x17f   : > { %v2537_v0 = vadd.f32 %v2416_v43, %v572_v63  ;;  %1968 = vset.pattern.permute.xlu2 %v2139_v52 }
 0x181   : > { %912 = vmatpush.msra.mxu1 %v2537_v0  ;;  %1886 = vmatpush.msra.mxu3 %v2537_v0  ;;  %v1986_v51 = vpack.i.bf16 %v2534_v42, %v2537_v0 }
 0x183   : > { %913 = vmatpush.msra.mxu1 %v2534_v42  ;;  %1887 = vmatpush.msra.mxu3 %v2534_v42  ;;  %v2544_v30 = vpop.permute.xlu0 %1154 }
 0x184   : > { %v2546_v1 = vpop.permute.xlu2 %716  ;;  %752 = vperm.xlu0 %1958, %v564_v38  }
 0x185   : > { %914 = vmatpush.msra.mxu1 %v2516_v33  ;;  %1888 = vmatpush.msra.mxu3 %v2516_v33 }
 0x186   : > { %740 = vperm.xlu2 %1968, %v2507_v60  }
 0x187   : > { %915 = vmatpush.msra.mxu1 %v564_v38  ;;  %1889 = vmatpush.msra.mxu3 %v564_v38 }
 0x189   : > { %916 = vmatpush.msra.mxu1 %v2552_v45  ;;  %1890 = vmatpush.msra.mxu3 %v2552_v45 }
 0x18b   : > { %917 = vmatpush.msra.mxu1 %v2493_v23  ;;  %1891 = vmatpush.msra.mxu3 %v2493_v23  ;;  %v626_v6 = vpop.permute.xlu0 %625  ;;  %v628_v53 = vpop.permute.xlu1 %627 }
 0x18c   : > { %1979 = vset.pattern.permute.xlu0 %v2140_v31 }
 0x18d   : > { %918 = vmatpush.msra.mxu1 %v2507_v60  ;;  %1892 = vmatpush.msra.mxu3 %v2507_v60  ;;  %v2563_v7 = vpop.permute.xlu2 %1166 }
 0x18e   : > { %1202 = vperm.xlu0 %1979, %v564_v38   ;;  %1970 = vrot.lane.b32.xlu2 %v1969_v46, %s2142_s14 }
 0x18f   : > { %919 = vmatpush.msra.mxu1 %v2479_v12  ;;  %1893 = vmatpush.msra.mxu3 %v2479_v12 }
 0x191   : > { %920 = vmatpush.msra.mxu1 %v2468_v13  ;;  %1894 = vmatpush.msra.mxu3 %v2468_v13 }
 0x193   : > { %921 = vmatpush.msra.mxu1 %v2483_v19  ;;  %1895 = vmatpush.msra.mxu3 %v2483_v19  ;;  %v2572_v34 = vpop.permute.xlu0 %708  ;;  %v630_v39 = vpop.permute.xlu1 %629 }
 0x195   : > { %922 = vmatpush.msra.mxu1 %v2462_v5  ;;  %1896 = vmatpush.msra.mxu3 %v2462_v5  ;;  %v2577_v48 = vpop.permute.xlu2 %1946 }
 0x196   : > { %1981 = vrot.lane.b32.xlu0 %v1980_v11, %s2142_s14  ;;  %645 = vrot.lane.b32.xlu2 %v2552_v45, %s2141_s13 }
 0x197   : > { %923 = vmatpush.msra.mxu1 %v2453_v10  ;;  %1897 = vmatpush.msra.mxu3 %v2453_v10 }
 0x198   : > { %1985 = vset.pattern.permute.xlu0 %v2139_v52 }
 0x199   : > { %924 = vmatpush.msra.mxu1 %v2443_v61  ;;  %1898 = vmatpush.msra.mxu3 %v2443_v61 }
 0x19b   : > { %925 = vmatpush.msra.mxu1 %v2431_v44  ;;  %1899 = vmatpush.msra.mxu3 %v2431_v44 }
 0x19c   : > { %v2589_v4 = vpop.permute.xlu0 %1162 }
 0x19d   : > { %926 = vmatpush.msra.mxu1 %v2425_v50  ;;  %1900 = vmatpush.msra.mxu3 %v2425_v50  ;;  %v632_v49 = vpop.permute.xlu2 %631 }
 0x19e   : > { %760 = vperm.xlu0 %1985, %v2534_v42   ;;  %748 = vperm.xlu2 %1968, %v2552_v45  }
 0x19f   : > { %927 = vmatpush.msra.mxu1 %v2419_v56  ;;  %1901 = vmatpush.msra.mxu3 %v2419_v56 }
 0x1a5   : > { %v2599_v37 = vpop.permute.xlu2 %1170  ;;  %v2601_v20 = vpop.permute.xlu0 %720 }
 0x1a6   : > { %653 = vrot.lane.b32.xlu0 %v2537_v0, %s2141_s13  ;;  %1975 = vrot.lane.b32.xlu2 %v1974_v17, %s2142_s14 }
 0x1a7   : > { %671 = vxpose.xlu1.b32.start [1/16] (narrow) %v2526_v27, 8  ;;  %1991 = vset.pattern.permute.xlu0 %v2140_v31 }
 0x1ad   : > { %v634_v52 = vpop.permute.xlu2 %633 }
 0x1ae   : > { %1987 = vrot.lane.b32.xlu0 %v1986_v51, %s2142_s14  ;;  %756 = vperm.xlu2 %1968, %v2516_v33   ;;  %v2612_v26 = vpop.permute.xlu0 %1174 }
 0x1af   : > { %672 = vxpose.xlu1.b32.cont [2/16] (narrow) %v626_v6, 8 }
 0x1b3   : > { %v638_v58 = vpop.permute.xlu1 %637 }
 0x1b5   : > { %v2614_v35 = vpop.permute.xlu2 %724 }
 0x1b6   : > { %651 = vrot.lane.b32.xlu2 %v2534_v42, %s2141_s13  ;;  %v2618_v41 = vpop.permute.xlu0 %1954 }
 0x1b7   : > { %673 = vxpose.xlu1.b32.cont [3/16] (narrow) %v628_v53, 8  ;;  %v1956_v17 = vunpack.i.l.bf16 %v2618_v41  ;;  %v1957_v51 = vunpack.i.h.bf16 %v2618_v41  ;;  %v1949_v53 = vunpack.i.h.bf16 %v2577_v48 }
 0x1bb   : > { %v2638_v8 = vpop.permute.xlu1 %1186 }
 0x1be   : > { %764 = vperm.xlu2 %1968, %v2537_v0   ;;  %v2621_v54 = vpop.permute.xlu2 %1178  ;;  %v636_v43 = vpop.permute.xlu0 %635 }
 0x1bf   : > { %674 = vxpose.xlu1.b32.cont [4/16] (narrow) %v630_v39, 8  ;;  %v1940_v39 = vunpack.i.l.bf16 %v2520_v24 }
 0x1c6   : > { %v2623_v55 = vpop.permute.xlu0 %728  ;;  %1992 = vset.pattern.permute.xlu2 %v2140_v31 }
 0x1c7   : > { %675 = vxpose.xlu1.b32.cont [5/16] (narrow) %v632_v49, 8  ;;  %v2626_v56 = vpop.permute.xlu2 %732 }
 0x1cb   : > { %v644_v3 = vpop.permute.xlu1 %643 }
 0x1ce   : > { %v2628_v47 = vpop.permute.xlu0 %1962 }
 0x1cf   : > { %676 = vxpose.xlu1.b32.cont [6/16] (narrow) %v634_v52, 8  ;;  %v1964_v11 = vunpack.i.l.bf16 %v2628_v47  ;;  %v1965_v49 = vunpack.i.h.bf16 %v2628_v47  ;;  %v1948_v52 = vunpack.i.l.bf16 %v2577_v48  ;;  %v2667_v47 = vld [vmem:[%s2662_s18] sm:$0xff]  }
 0x1d0   : > { %v2630_v50 = vpop.permute.xlu2 %1182 }
 0x1d6   : > { %v2632_v57 = vpop.permute.xlu0 %736 }
 0x1d7   : > { %677 = vxpose.xlu1.b32.cont [7/16] (narrow) %v636_v43, 8  ;;  %v1941_v43 = vunpack.i.h.bf16 %v2520_v24 }
 0x1d8   : > { %v640_v44 = vpop.permute.xlu2 %639 }
 0x1de   : > { %v642_v59 = vpop.permute.xlu0 %641 }
 0x1df   : > { %678 = vxpose.xlu1.b32.cont [8/16] (narrow) %v638_v58, 8  ;;  %v1850_v58 = vunpack.c.h.bf16 %v2667_v47 }
 0x1e0   : > { %v2634_v61 = vpop.permute.xlu2 %740 }
 0x1e3   : > { %v650_v19 = vpop.permute.xlu1 %649 }
 0x1e6   : > { %v2636_v62 = vpop.permute.xlu0 %744 }
 0x1e7   : > { %679 = vxpose.xlu1.b32.cont [9/16] (narrow) %v640_v44, 8 }
 0x1e8   : > { %v1971_v31 = vpop.permute.xlu2 %1970 }
 0x1e9   : > { %v1972_v6 = vunpack.i.l.bf16 %v1971_v31  ;;  %v1973_v46 = vunpack.i.h.bf16 %v1971_v31 }
 0x1ee   : > { %v648_v10 = vpop.permute.xlu0 %647 }
 0x1ef   : > { %680 = vxpose.xlu1.b32.cont [10/16] (narrow) %v642_v59, 8  ;;  %v1849_v59 = vunpack.c.l.bf16 %v2667_v47 }
 0x1f0   : > { %v646_v2 = vpop.permute.xlu2 %645 }
 0x1f6   : > { %v2640_v5 = vpop.permute.xlu0 %752 }
 0x1f7   : > { %681 = vxpose.xlu1.b32.cont [11/16] (narrow) %v644_v3, 8 }
 0x1f8   : > { %v2642_v9 = vpop.permute.xlu2 %748 }
 0x1ff   : > { %682 = vxpose.xlu1.b32.cont [12/16] (narrow) %v646_v2, 8 }
 0x200   : > { %v2644_v13 = vpop.permute.xlu0 %1202  ;;  %v1976_v14 = vpop.permute.xlu2 %1975 }
 0x201   : > { %v1977_v27 = vunpack.i.l.bf16 %v1976_v14  ;;  %v1978_v63 = vunpack.i.h.bf16 %v1976_v14 }
 0x207   : > { %683 = vxpose.xlu1.b32.cont [13/16] (narrow) %v648_v10, 8 }
 0x208   : > { %v1982_v16 = vpop.permute.xlu0 %1981  ;;  %v2646_v12 = vpop.permute.xlu2 %756 }
 0x209   : > { %v1983_v36 = vunpack.i.l.bf16 %v1982_v16  ;;  %v1984_v38 = vunpack.i.h.bf16 %v1982_v16 }
 0x20f   : > { %684 = vxpose.xlu1.b32.cont [14/16] (narrow) %v650_v19, 8  ;;  %v2688_v19 = vld [vmem:[%s2662_s18 + $0x8] sm:$0xff]  }
 0x210   : > { %v2648_v15 = vpop.permute.xlu0 %760  ;;  %v652_v22 = vpop.permute.xlu2 %651 }
 0x217   : > { %685 = vxpose.xlu1.b32.cont [15/16] (narrow) %v652_v22, 8 }
 0x218   : > { %v654_v25 = vpop.permute.xlu0 %653 }
 0x21f   : > { %686 = vxpose.xlu1.b32.end [16/16] (narrow) %v654_v25, 8 }
 0x220   : > { %v1988_v18 = vpop.permute.xlu0 %1987 }
 0x221   : > { %v1989_v29 = vunpack.i.l.bf16 %v1988_v18  ;;  %v1990_v32 = vunpack.i.h.bf16 %v1988_v18 }
 0x223   : > { %1410 = vmatpush.msra.mxu2 %v1989_v29  ;;  %1902 = vmatpush.msrb.mxu3 %v1989_v29 }
 0x225   : > { %1411 = vmatpush.msra.mxu2 %v1990_v32  ;;  %1903 = vmatpush.msrb.mxu3 %v1990_v32 }
 0x227   : > { %1412 = vmatpush.msra.mxu2 %v1983_v36  ;;  %1904 = vmatpush.msrb.mxu3 %v1983_v36 }
 0x229   : > { %1413 = vmatpush.msra.mxu2 %v1984_v38  ;;  %1905 = vmatpush.msrb.mxu3 %v1984_v38 }
 0x22b   : > { %1414 = vmatpush.msra.mxu2 %v1977_v27  ;;  %1906 = vmatpush.msrb.mxu3 %v1977_v27 }
 0x22d   : > { %1415 = vmatpush.msra.mxu2 %v1978_v63  ;;  %1907 = vmatpush.msrb.mxu3 %v1978_v63  ;;  %v2707_v63 = vld [vmem:[%s2662_s18 + $0x10] sm:$0xff]  }
 0x22f   : > { %1416 = vmatpush.msra.mxu2 %v1972_v6  ;;  %1908 = vmatpush.msrb.mxu3 %v1972_v6 }
 0x231   : > { %1417 = vmatpush.msra.mxu2 %v1973_v46  ;;  %1909 = vmatpush.msrb.mxu3 %v1973_v46 }
 0x233   : > { %1418 = vmatpush.msra.mxu2 %v1964_v11  ;;  %1910 = vmatpush.msrb.mxu3 %v1964_v11 }
 0x235   : > { %1419 = vmatpush.msra.mxu2 %v1965_v49  ;;  %1911 = vmatpush.msrb.mxu3 %v1965_v49 }
 0x237   : > { %1420 = vmatpush.msra.mxu2 %v1956_v17  ;;  %1912 = vmatpush.msrb.mxu3 %v1956_v17 }
 0x239   : > { %1421 = vmatpush.msra.mxu2 %v1957_v51  ;;  %1913 = vmatpush.msrb.mxu3 %v1957_v51 }
 0x23b   : > { %1422 = vmatpush.msra.mxu2 %v1948_v52  ;;  %1914 = vmatpush.msrb.mxu3 %v1948_v52 }
 0x23d   : > { %1423 = vmatpush.msra.mxu2 %v1949_v53  ;;  %1915 = vmatpush.msrb.mxu3 %v1949_v53 }
 0x23f   : > { %1424 = vmatpush.msra.mxu2 %v1940_v39  ;;  %1916 = vmatpush.msrb.mxu3 %v1940_v39  ;;  %v2726_v39 = vld [vmem:[%s2662_s18 + $0x18] sm:$0xff]  }
 0x241   : > { %1425 = vmatpush.msra.mxu2 %v1941_v43  ;;  %1917 = vmatpush.msrb.mxu3 %v1941_v43 }
 0x24b   : > { %v687_v41 = vpop.trf.xlu1 }
 0x24c   : > { %v2664_v48 = vperm.slane %v687_v41, 0 }
 0x24e   : > { %v769_v44 = vadd.f32 %v2664_v48, %v2572_v34  ;;  %v768_v24 = vadd.f32 %v2664_v48, %v2502_v28  ;;  %v770_v2 = vadd.f32 %v2664_v48, %v2528_v40  ;;  %v771_v3 = vadd.f32 %v2664_v48, %v2546_v1 }
 0x24f   : > { %v1853_v40 = vunpack.c.l.bf16 %v2688_v19  ;;  %v1854_v1 = vunpack.c.h.bf16 %v2688_v19  ;;  %v772_v32 = vadd.f32 %v2664_v48, %v2601_v20  ;;  %v773_v36 = vadd.f32 %v2664_v48, %v2614_v35 }
 0x250   : > { %v785_v31 = vmul.f32 0.01, %v769_v44  ;;  %v784_v10 = vmul.f32 0.01, %v768_v24  ;;  %v786_v22 = vmul.f32 0.01, %v770_v2  ;;  %v1857_v20 = vunpack.c.l.bf16 %v2707_v63 }
 0x251   : > { %v787_v25 = vmul.f32 0.01, %v771_v3  ;;  %v788_v6 = vmul.f32 0.01, %v772_v32  ;;  %v789_v46 = vmul.f32 0.01, %v773_v36  ;;  %v1858_v35 = vunpack.c.h.bf16 %v2707_v63 }
 0x252   : > { %v801_v14 = vmax.f32 %v769_v44, %v785_v31  ;;  %v800_v16 = vmax.f32 %v768_v24, %v784_v10  ;;  %v802_v18 = vmax.f32 %v770_v2, %v786_v22  ;;  %v774_v17 = vadd.f32 %v2664_v48, %v2623_v55 }
 0x253   : > { %v803_v29 = vmax.f32 %v771_v3, %v787_v25  ;;  %v804_v11 = vmax.f32 %v772_v32, %v788_v6  ;;  %v805_v49 = vmax.f32 %v773_v36, %v789_v46  ;;  %v775_v51 = vadd.f32 %v2664_v48, %v2626_v56 }
 0x254   : > { %v2681_v34 = vadd.f32 %v1850_v58, %v801_v14  ;;  %v2685_v28 = vadd.f32 %v1849_v59, %v800_v16  ;;  %v2700_v38 = vadd.f32 %v1853_v40, %v802_v18  ;;  %v790_v43 = vmul.f32 0.01, %v774_v17  ;;  %v2745_v16 = vld [vmem:[%s2662_s18 + $0x20] sm:$0xff]  }
 0x255   : > { %v2704_v27 = vadd.f32 %v1854_v1, %v803_v29  ;;  %v2719_v52 = vadd.f32 %v1857_v20, %v804_v11  ;;  %v2723_v53 = vadd.f32 %v1858_v35, %v805_v49  ;;  %v791_v44 = vmul.f32 0.01, %v775_v51  ;;  %v2768_v49 = vld [vmem:[%s2662_s18 + $0x28] sm:$0xff]  }
 0x256   : > { %834 = vmax.xlane.f32.xlu2 %v2681_v34  ;;  %832 = vmax.xlane.f32.xlu0 %v2685_v28  ;;  %v1861_v55 = vunpack.c.l.bf16 %v2726_v39  ;;  %v1862_v56 = vunpack.c.h.bf16 %v2726_v39  ;;  %v806_v24 = vmax.f32 %v774_v17, %v790_v43  ;;  %v776_v10 = vadd.f32 %v2664_v48, %v2632_v57 }
 0x257   : > { %v807_v31 = vmax.f32 %v775_v51, %v791_v44  ;;  %v777_v2 = vadd.f32 %v2664_v48, %v2634_v61  ;;  %v2747_v18 = vperm.slane %v687_v41, 1  ;;  %v1865_v57 = vunpack.c.l.bf16 %v2745_v16 }
 0x258   : > { %v2738_v3 = vadd.f32 %v1861_v55, %v806_v24  ;;  %v792_v22 = vmul.f32 0.01, %v776_v10  ;;  %v3265_v61 = vunpack.c.h.bf16 %v2745_v16  ;;  %v778_v36 = vadd.f32 %v2664_v48, %v2636_v62 }
 0x259   : > { %v2742_v14 = vadd.f32 %v1862_v56, %v807_v31  ;;  %v793_v25 = vmul.f32 0.01, %v777_v2  ;;  %v779_v6 = vadd.f32 %v2664_v48, %v2642_v9  ;;  %v1218_v41 = vadd.f32 %v2747_v18, %v2544_v30 }
 0x25a   : > { %v808_v29 = vmax.f32 %v776_v10, %v792_v22  ;;  %v794_v17 = vmul.f32 0.01, %v778_v36  ;;  %v1869_v30 = vunpack.c.l.bf16 %v2768_v49  ;;  %v3264_v9 = vunpack.c.h.bf16 %v2768_v49 }
 0x25b   : > { %v809_v32 = vmax.f32 %v777_v2, %v793_v25  ;;  %v795_v51 = vmul.f32 0.01, %v779_v6  ;;  %v1234_v62 = vmul.f32 0.01, %v1218_v41  ;;  %v780_v24 = vadd.f32 %v2664_v48, %v2640_v5 }
 0x25c   : > { %v2761_v46 = vadd.f32 %v1865_v57, %v808_v29  ;;  %v810_v43 = vmax.f32 %v778_v36, %v794_v17  ;;  %v781_v31 = vadd.f32 %v2664_v48, %v2646_v12  ;;  %v1221_v2 = vadd.f32 %v2747_v18, %v2563_v7  ;;  %v2789_v29 = vld [vmem:[%s2662_s18 + $0x30] sm:$0xff]   ;;  %v765_v7 = vpop.permute.xlu2 %764 }
 0x25d   : > { %v2765_v11 = vadd.f32 %v3265_v61, %v809_v32  ;;  %v811_v44 = vmax.f32 %v779_v6, %v795_v51  ;;  %v1250_v10 = vmax.f32 %v1218_v41, %v1234_v62  ;;  %v796_v32 = vmul.f32 0.01, %v780_v24  ;;  %v2814_v61 = vld [vmem:[%s2662_s18 + $0x38] sm:$0xff]  }
 0x25e   : > { %836 = vmax.xlane.f32.xlu2 %v2700_v38  ;;  %838 = vmax.xlane.f32.xlu0 %v2704_v27  ;;  %v2782_v22 = vadd.f32 %v1869_v30, %v810_v43  ;;  %v797_v36 = vmul.f32 0.01, %v781_v31  ;;  %v1237_v12 = vmul.f32 0.01, %v1221_v2  ;;  %v1873_v6 = vunpack.c.l.bf16 %v2789_v29 }
 0x25f   : > { %v2786_v25 = vadd.f32 %v3264_v9, %v811_v44  ;;  %v2793_v5 = vadd.f32 %v1849_v59, %v1250_v10  ;;  %v1874_v41 = vunpack.c.h.bf16 %v2789_v29  ;;  %v812_v17 = vmax.f32 %v780_v24, %v796_v32 }
 0x260   : > { %v813_v51 = vmax.f32 %v781_v31, %v797_v36  ;;  %v782_v62 = vadd.f32 %v2664_v48, %v2648_v15  ;;  %v783_v59 = vadd.f32 %v2664_v48, %v765_v7  ;;  %v1253_v43 = vmax.f32 %v1221_v2, %v1237_v12 }
 0x261   : > { %v1223_v44 = vadd.f32 %v2747_v18, %v2612_v26  ;;  %v2807_v10 = vadd.f32 %v1873_v6, %v812_v17  ;;  %v1877_v26 = vunpack.c.l.bf16 %v2814_v61  ;;  %v1878_v32 = vunpack.c.h.bf16 %v2814_v61 }
 0x262   : > { %v2811_v9 = vadd.f32 %v1874_v41, %v813_v51  ;;  %v798_v24 = vmul.f32 0.01, %v782_v62  ;;  %v799_v31 = vmul.f32 0.01, %v783_v59  ;;  %v2818_v15 = vadd.f32 %v1854_v1, %v1253_v43 }
 0x263   : > { %v1239_v48 = vmul.f32 0.01, %v1223_v44  ;;  %v1219_v12 = vadd.f32 %v2747_v18, %v2510_v21  ;;  %v3266_v39 = vunpack.c.h.bf16 %v2745_v16 }
 0x264   : > { %v814_v2 = vmax.f32 %v782_v62, %v798_v24  ;;  %v815_v36 = vmax.f32 %v783_v59, %v799_v31 }
 0x265   : > { %v1255_v7 = vmax.f32 %v1223_v44, %v1239_v48  ;;  %v1235_v51 = vmul.f32 0.01, %v1219_v12 }
 0x266   : > { %840 = vmax.xlane.f32.xlu2 %v2719_v52  ;;  %842 = vmax.xlane.f32.xlu0 %v2723_v53  ;;  %v2829_v1 = vadd.f32 %v1877_v26, %v814_v2  ;;  %v2833_v17 = vadd.f32 %v1878_v32, %v815_v36 }
 0x267   : > { %v2837_v43 = vadd.f32 %v1858_v35, %v1255_v7  ;;  %v1251_v21 = vmax.f32 %v1219_v12, %v1235_v51  ;;  %v1222_v35 = vadd.f32 %v2747_v18, %v2599_v37 }
 0x269   : > { %v2844_v62 = vadd.f32 %v1850_v58, %v1251_v21  ;;  %v1238_v58 = vmul.f32 0.01, %v1222_v35 }
 0x26b   : > { %v1254_v31 = vmax.f32 %v1222_v35, %v1238_v58 }
 0x26d   : > { %v2862_v37 = vadd.f32 %v1857_v20, %v1254_v31 }
 0x26e   : > { %844 = vmax.xlane.f32.xlu2 %v2738_v3  ;;  %846 = vmax.xlane.f32.xlu0 %v2742_v14 }
 0x276   : > { %848 = vmax.xlane.f32.xlu2 %v2761_v46  ;;  %850 = vmax.xlane.f32.xlu0 %v2765_v11 }
 0x27e   : > { %852 = vmax.xlane.f32.xlu2 %v2782_v22  ;;  %854 = vmax.xlane.f32.xlu0 %v2786_v25 }
 0x27f   : > { %1282 = vmax.xlane.f32.xlu1 %v2793_v5 }
 0x286   : > { %856 = vmax.xlane.f32.xlu2 %v2807_v10  ;;  %858 = vmax.xlane.f32.xlu0 %v2811_v9 }
 0x287   : > { %1288 = vmax.xlane.f32.xlu1 %v2818_v15 }
 0x28e   : > { %860 = vmax.xlane.f32.xlu2 %v2829_v1  ;;  %862 = vmax.xlane.f32.xlu0 %v2833_v17 }
 0x28f   : > { %1292 = vmax.xlane.f32.xlu1 %v2837_v43 }
 0x296   : > { %1284 = vmax.xlane.f32.xlu0 %v2844_v62 }
 0x2a6   : > { %1206 = vperm.xlu2 %1992, %v2516_v33   ;;  %v1224_v33 = vadd.f32 %v2747_v18, %v2621_v54 }
 0x2a8   : > { %1214 = vperm.xlu1 %1967, %v2537_v0   ;;  %v1240_v48 = vmul.f32 0.01, %v1224_v33 }
 0x2aa   : > { %1190 = vperm.xlu0 %1991, %v2507_v60   ;;  %v1256_v54 = vmax.f32 %v1224_v33, %v1240_v48 }
 0x2ac   : > { %v2870_v63 = vadd.f32 %v1861_v55, %v1256_v54 }
 0x2ae   : > { %1194 = vperm.xlu2 %1992, %v2493_v23  }
 0x2b6   : > { %1210 = vperm.xlu2 %1992, %v2534_v42   ;;  %v1220_v42 = vadd.f32 %v2747_v18, %v2589_v4 }
 0x2b8   : > { %v1236_v36 = vmul.f32 0.01, %v1220_v42 }
 0x2ba   : > { %v1252_v51 = vmax.f32 %v1220_v42, %v1236_v36 }
 0x2c9   : > { %v835_v59 = vpop.xlane.xlu2 %834  ;;  %v833_v44 = vpop.xlane.xlu0 %832 }
 0x2ca   : > { %v864_v47 = vsub.f32 %v2685_v28, %v833_v44  ;;  %v865_v0 = vsub.f32 %v2681_v34, %v835_v59  ;;  %v1226_v34 = vadd.f32 %v2747_v18, %v2638_v8  ;;  %v2875_v59 = vadd.f32 %v1853_v40, %v1252_v51 }
 0x2cc   : > { %v880_v24 = vmul.f32 1.442695, %v864_v47  ;;  %v882_v28 = vmul.f32 1.442695, %v865_v0  ;;  %v1242_v20 = vmul.f32 0.01, %v1226_v34 }
 0x2ce   : > { %2002 = vpow2.f32 %v880_v24  ;;  %v1258_v8 = vmax.f32 %v1226_v34, %v1242_v20 }
 0x2cf   : > { %2004 = vpow2.f32 %v882_v28 }
 0x2d0   : > { %v2883_v58 = vadd.f32 %v1865_v57, %v1258_v8 }
 0x2d1   : > { %v837_v60 = vpop.xlane.xlu2 %836  ;;  %v839_v23 = vpop.xlane.xlu0 %838 }
 0x2d2   : > { %v866_v12 = vsub.f32 %v2700_v38, %v837_v60  ;;  %v1230_v38 = vadd.f32 %v2747_v18, %v2644_v13  ;;  %v867_v44 = vsub.f32 %v2704_v27, %v839_v23 }
 0x2d4   : > { %1290 = vmax.xlane.f32.xlu0 %v2862_v37  ;;  %v2003_v2 = vpop.eup %2002  ;;  %v884_v21 = vmul.f32 1.442695, %v866_v12  ;;  %v1246_v24 = vmul.f32 0.01, %v1230_v38  ;;  %v886_v19 = vmul.f32 1.442695, %v867_v44 }
 0x2d5   : > { %928 = vmatmul.f32.vlgmr.msra.gmra.mxu1 %v2003_v2  ;;  %v2005_v35 = vpop.eup %2004 }
 0x2d6   : > { %2006 = vpow2.f32 %v884_v21  ;;  %v1262_v31 = vmax.f32 %v1230_v38, %v1246_v24 }
 0x2d7   : > { %2008 = vpow2.f32 %v886_v19 }
 0x2d8   : > { %v2891_v0 = vadd.f32 %v1873_v6, %v1262_v31 }
 0x2d9   : > { %v841_v7 = vpop.xlane.xlu2 %840  ;;  %v843_v4 = vpop.xlane.xlu0 %842 }
 0x2da   : > { %v868_v13 = vsub.f32 %v2719_v52, %v841_v7  ;;  %v869_v23 = vsub.f32 %v2723_v53, %v843_v4 }
 0x2dc   : > { %1294 = vmax.xlane.f32.xlu0 %v2870_v63  ;;  %v2007_v40 = vpop.eup %2006  ;;  %v888_v60 = vmul.f32 1.442695, %v868_v13  ;;  %v890_v28 = vmul.f32 1.442695, %v869_v23 }
 0x2dd   : > { %931 = vmatmul.f32.gmra.mxu1 %v2005_v35  ;;  %v2009_v57 = vpop.eup %2008 }
 0x2de   : > { %2010 = vpow2.f32 %v888_v60 }
 0x2df   : > { %1286 = vmax.xlane.f32.xlu2 %v2875_v59  ;;  %2012 = vpow2.f32 %v890_v28 }
 0x2e1   : > { %v845_v55 = vpop.xlane.xlu2 %844  ;;  %v847_v47 = vpop.xlane.xlu0 %846 }
 0x2e2   : > { %v870_v6 = vsub.f32 %v2738_v3, %v845_v55  ;;  %v871_v21 = vsub.f32 %v2742_v14, %v847_v47 }
 0x2e4   : > { %1298 = vmax.xlane.f32.xlu0 %v2883_v58  ;;  %v2011_v36 = vpop.eup %2010  ;;  %v892_v7 = vmul.f32 1.442695, %v870_v6  ;;  %v894_v8 = vmul.f32 1.442695, %v871_v21 }
 0x2e5   : > { %934 = vmatmul.f32.gmra.mxu1 %v2007_v40  ;;  %v2013_v51 = vpop.eup %2012 }
 0x2e9   : > { %v849_v33 = vpop.xlane.xlu2 %848  ;;  %v2887_v27 = vpop.xlane.xlu0 %850 }
 0x2ea   : > { %v872_v55 = vsub.f32 %v2761_v46, %v849_v33  ;;  %v873_v46 = vsub.f32 %v2765_v11, %v2887_v27 }
 0x2ec   : > { %1306 = vmax.xlane.f32.xlu0 %v2891_v0  ;;  %v896_v31 = vmul.f32 1.442695, %v872_v55  ;;  %v898_v6 = vmul.f32 1.442695, %v873_v46 }
 0x2ed   : > { %937 = vmatmul.f32.gmra.mxu1 %v2009_v57 }
 0x2f1   : > { %v2895_v42 = vpop.xlane.xlu2 %852  ;;  %v2897_v48 = vpop.xlane.xlu0 %854 }
 0x2f2   : > { %v1283_v52 = vpop.xlane.xlu1 %1282  ;;  %v874_v27 = vsub.f32 %v2782_v22, %v2895_v42 }
 0x2f3   : > { %v1314_v2 = vsub.f32 %v2793_v5, %v1283_v52 }
 0x2f5   : > { %v1330_v54 = vmul.f32 1.442695, %v1314_v2  ;;  %940 = vmatmul.f32.gmra.mxu1 %v2011_v36 }
 0x2f7   : > { %1198 = vperm.xlu2 %1992, %v2552_v45   ;;  %2014 = vpow2.f32 %v1330_v54 }
 0x2f9   : > { %v857_v34 = vpop.xlane.xlu2 %856  ;;  %v859_v12 = vpop.xlane.xlu0 %858 }
 0x2fa   : > { %v876_v53 = vsub.f32 %v2807_v10, %v857_v34  ;;  %v877_v5 = vsub.f32 %v2811_v9, %v859_v12  ;;  %v2907_v9 = vpop.xlane.xlu1 %1288 }
 0x2fc   : > { %v904_v4 = vmul.f32 1.442695, %v876_v53  ;;  %v906_v45 = vmul.f32 1.442695, %v877_v5 }
 0x2fd   : > { %v2015_v20 = vpop.eup %2014  ;;  %943 = vmatmul.f32.gmra.mxu1 %v2013_v51 }
 0x2fe   : > { %2016 = vpow2.f32 %v904_v4  ;;  %1426 = vmatmul.f32.vlgmr.msra.gmra.mxu2 %v2015_v20  ;;  %v900_v20 = vmul.f32 1.442695, %v874_v27 }
 0x2ff   : > { %2018 = vpow2.f32 %v892_v7 }
 0x300   : > { %2020 = vpow2.f32 %v906_v45 }
 0x301   : > { %v861_v3 = vpop.xlane.xlu2 %860  ;;  %v863_v35 = vpop.xlane.xlu0 %862  ;;  %2022 = vpow2.f32 %v894_v8  ;;  %v875_v8 = vsub.f32 %v2786_v25, %v2897_v48 }
 0x302   : > { %v878_v10 = vsub.f32 %v2829_v1, %v861_v3  ;;  %v879_v23 = vsub.f32 %v2833_v17, %v863_v35  ;;  %v2918_v2 = vpop.xlane.xlu1 %1292  ;;  %v1225_v17 = vadd.f32 %v2747_v18, %v2630_v50 }
 0x304   : > { %v2017_v38 = vpop.eup %2016  ;;  %v908_v24 = vmul.f32 1.442695, %v878_v10  ;;  %v910_v28 = vmul.f32 1.442695, %v879_v23 }
 0x305   : > { %v2019_v44 = vpop.eup %2018  ;;  %964 = vmatmul.f32.vlgmr.msra.gmra.mxu3 %v2017_v38 }
 0x306   : > { %946 = vmatmul.f32.gmra.mxu1 %v2019_v44  ;;  %v2021_v13 = vpop.eup %2020  ;;  %2024 = vpow2.f32 %v908_v24  ;;  %v902_v24 = vmul.f32 1.442695, %v875_v8 }
 0x307   : > { %v2023_v1 = vpop.eup %2022 }
 0x309   : > { %v1207_v19 = vpop.permute.xlu2 %1206  ;;  %v1285_v14 = vpop.xlane.xlu0 %1284 }
 0x30a   : > { %v1231_v47 = vadd.f32 %v2747_v18, %v1207_v19  ;;  %v1315_v40 = vsub.f32 %v2844_v62, %v1285_v14 }
 0x30c   : > { %v1247_v60 = vmul.f32 0.01, %v1231_v47  ;;  %v1332_v57 = vmul.f32 1.442695, %v1315_v40  ;;  %v2025_v54 = vpop.eup %2024 }
 0x30d   : > { %967 = vmatmul.f32.gmra.mxu3 %v2021_v13  ;;  %v1317_v13 = vsub.f32 %v2818_v15, %v2907_v9  ;;  %v3267_v9 = vunpack.c.h.bf16 %v2768_v49 }
 0x30e   : > { %v1263_v52 = vmax.f32 %v1231_v47, %v1247_v60  ;;  %2026 = vpow2.f32 %v1332_v57  ;;  %949 = vmatmul.f32.gmra.mxu1 %v2023_v1 }
 0x30f   : > { %2028 = vpow2.f32 %v896_v31  ;;  %v1336_v61 = vmul.f32 1.442695, %v1317_v13 }
 0x310   : > { %v2916_v33 = vadd.f32 %v1874_v41, %v1263_v52  ;;  %2030 = vpow2.f32 %v910_v28  ;;  %v1241_v41 = vmul.f32 0.01, %v1225_v17  ;;  %v2143_v52 = vmov 8  }
 0x311   : > { %v1195_v62 = vpop.permute.xlu2 %1194  ;;  %2032 = vpow2.f32 %v898_v6  ;;  %1993 = vset.pattern.permute.xlu2 %v2143_v52  ;;  %1994 = vset.pattern.permute.xlu0 %v2143_v52 }
 0x312   : > { %v1228_v36 = vadd.f32 %v2747_v18, %v1195_v62  ;;  %1308 = vmax.xlane.f32.xlu0 %v2916_v33  ;;  %v1257_v51 = vmax.f32 %v1225_v17, %v1241_v41  ;;  %2034 = vpow2.f32 %v900_v20  ;;  %1995 = vset.pattern.permute.xlu1 %v2143_v52 }
 0x313   : > { %2036 = vpow2.f32 %v902_v24 }
 0x314   : > { %v2027_v34 = vpop.eup %2026  ;;  %v1244_v12 = vmul.f32 0.01, %v1228_v36 }
 0x315   : > { %v2029_v11 = vpop.eup %2028  ;;  %970 = vmatmul.f32.gmra.mxu3 %v2025_v54  ;;  %1429 = vmatmul.f32.gmra.mxu2 %v2027_v34 }
 0x316   : > { %v1260_v29 = vmax.f32 %v1228_v36, %v1244_v12  ;;  %952 = vmatmul.f32.gmra.mxu1 %v2029_v11  ;;  %v2031_v5 = vpop.eup %2030 }
 0x317   : > { %v2033_v45 = vpop.eup %2032 }
 0x318   : > { %v2928_v53 = vadd.f32 %v1869_v30, %v1260_v29  ;;  %v2936_v30 = vadd.f32 %v1862_v56, %v1257_v51  ;;  %v2035_v14 = vpop.eup %2034 }
 0x319   : > { %v1211_v50 = vpop.permute.xlu2 %1210 }
 0x31a   : > { %v1232_v7 = vadd.f32 %v2747_v18, %v1211_v50  ;;  %v1215_v4 = vpop.permute.xlu1 %1214  ;;  %1302 = vmax.xlane.f32.xlu0 %v2928_v53 }
 0x31b   : > { %v1233_v3 = vadd.f32 %v2747_v18, %v1215_v4 }
 0x31c   : > { %v1248_v21 = vmul.f32 0.01, %v1232_v7  ;;  %v1191_v35 = vpop.permute.xlu0 %1190 }
 0x31d   : > { %v1227_v22 = vadd.f32 %v2747_v18, %v1191_v35  ;;  %973 = vmatmul.f32.gmra.mxu3 %v2031_v5  ;;  %v1249_v44 = vmul.f32 0.01, %v1233_v3 }
 0x31e   : > { %v1264_v42 = vmax.f32 %v1232_v7, %v1248_v21  ;;  %955 = vmatmul.f32.gmra.mxu1 %v2033_v45 }
 0x31f   : > { %v1243_v38 = vmul.f32 0.01, %v1227_v22  ;;  %v1265_v19 = vmax.f32 %v1233_v3, %v1249_v44 }
 0x320   : > { %1296 = vmax.xlane.f32.xlu2 %v2936_v30  ;;  %v2943_v10 = vadd.f32 %v1877_v26, %v1264_v42  ;;  %v2037_v26 = vpop.eup %2036 }
 0x321   : > { %v1259_v55 = vmax.f32 %v1227_v22, %v1243_v38  ;;  %v2953_v25 = vadd.f32 %v1878_v32, %v1265_v19 }
 0x322   : > { %1310 = vmax.xlane.f32.xlu0 %v2943_v10 }
 0x323   : > { %v2948_v56 = vadd.f32 %v3266_v39, %v1259_v55 }
 0x325   : > { %1300 = vmax.xlane.f32.xlu1 %v2948_v56 }
 0x326   : > { %958 = vmatmul.f32.gmra.mxu1 %v2035_v14 }
 0x32a   : > { %1312 = vmax.xlane.f32.xlu0 %v2953_v25 }
 0x32e   : > { %961 = vmatmul.f32.gmra.mxu1 %v2037_v26 }
 0x347   : > { %v1291_v48 = vpop.xlane.xlu0 %1290 }
 0x348   : > { %v1318_v46 = vsub.f32 %v2862_v37, %v1291_v48  ;;  %v1319_v37 = vsub.f32 %v2837_v43, %v2918_v2 }
 0x34a   : > { %v1340_v6 = vmul.f32 1.442695, %v1319_v37 }
 0x34f   : > { %v1295_v47 = vpop.xlane.xlu0 %1294 }
 0x350   : > { %v1320_v12 = vsub.f32 %v2870_v63, %v1295_v47 }
 0x352   : > { %v1287_v40 = vpop.xlane.xlu2 %1286  ;;  %v2969_v54 = vpop.f32.mrf.mxu1  ;;  %v1342_v29 = vmul.f32 1.442695, %v1320_v12 }
 0x353   : > { %v1316_v16 = vsub.f32 %v2875_v59, %v1287_v40 }
 0x355   : > { %v1334_v31 = vmul.f32 1.442695, %v1316_v16 }
 0x357   : > { %2038 = vpow2.f32 %v1334_v31  ;;  %v2959_v60 = vpop.xlane.xlu0 %1298 }
 0x358   : > { %2040 = vpow2.f32 %v1336_v61  ;;  %v1322_v16 = vsub.f32 %v2883_v58, %v2959_v60 }
 0x35a   : > { %v1199_v57 = vpop.permute.xlu2 %1198  ;;  %v2976_v50 = vpop.f32.mrf.mxu1 }
 0x35b   : > { %v1229_v32 = vadd.f32 %v2747_v18, %v1199_v57  ;;  %v1338_v18 = vmul.f32 1.442695, %v1318_v46 }
 0x35d   : > { %v2039_v1 = vpop.eup %2038  ;;  %v1245_v23 = vmul.f32 0.01, %v1229_v32 }
 0x35e   : > { %1432 = vmatmul.f32.gmra.mxu2 %v2039_v1  ;;  %v2041_v17 = vpop.eup %2040 }
 0x35f   : > { %v1261_v59 = vmax.f32 %v1229_v32, %v1245_v23  ;;  %v1307_v62 = vpop.xlane.xlu0 %1306 }
 0x360   : > { %v1326_v15 = vsub.f32 %v2891_v0, %v1307_v62 }
 0x361   : > { %v2966_v28 = vadd.f32 %v3267_v9, %v1261_v59 }
 0x362   : > { %v1354_v36 = vmul.f32 1.442695, %v1326_v15  ;;  %v3007_v62 = vpop.f32.mrf.mxu1 }
 0x363   : > { %1304 = vmax.xlane.f32.xlu2 %v2966_v28 }
 0x364   : > { %2042 = vpow2.f32 %v1354_v36 }
 0x365   : > { %2044 = vpow2.f32 %v1338_v18 }
 0x366   : > { %1435 = vmatmul.f32.gmra.mxu2 %v2041_v17  ;;  %2046 = vrcp.f32 %v2969_v54 }
 0x367   : > { %2048 = vpow2.f32 %v1340_v6 }
 0x368   : > { %2050 = vpow2.f32 %v1342_v29 }
 0x36a   : > { %v2043_v0 = vpop.eup %2042 }
 0x36b   : > { %1462 = vmatmul.f32.vlgmr.msrb.gmra.mxu3 %v2043_v0  ;;  %v2045_v49 = vpop.eup %2044 }
 0x36c   : > { %v2047_v34 = vpop.eup %2046 }
 0x36d   : > { %v993_v11 = vmul.f32 %v2047_v34, %v2969_v54  ;;  %v2049_v41 = vpop.eup %2048 }
 0x36e   : > { %1438 = vmatmul.f32.gmra.mxu2 %v2045_v49  ;;  %v2051_v2 = vpop.eup %2050 }
 0x36f   : > { %v1009_v27 = vsub.f32 2.0, %v993_v11 }
 0x371   : > { %v1025_v43 = vmul.f32 %v2047_v34, %v1009_v27 }
 0x376   : > { %1441 = vmatmul.f32.gmra.mxu2 %v2049_v41 }
 0x37b   : > { %1043 = vperm.xlu2 %1993, %v1025_v43  }
 0x37e   : > { %1444 = vmatmul.f32.gmra.mxu2 %v2051_v2 }
 0x381   : > { %v2978_v7 = vpop.f32.mrf.mxu2 }
 0x382   : > { %2052 = vrcp.f32 %v2978_v7 }
 0x383   : > { %2054 = vrcp.f32 %v2976_v50 }
 0x385   : > { %v1309_v63 = vpop.xlane.xlu0 %1308 }
 0x386   : > { %v1327_v4 = vsub.f32 %v2916_v33, %v1309_v63 }
 0x388   : > { %v1356_v51 = vmul.f32 1.442695, %v1327_v4  ;;  %v2983_v20 = vpop.f32.mrf.mxu3  ;;  %v2053_v5 = vpop.eup %2052 }
 0x389   : > { %2056 = vrcp.f32 %v2983_v20  ;;  %v1491_v21 = vmul.f32 %v2053_v5, %v2978_v7  ;;  %v2055_v3 = vpop.eup %2054 }
 0x38a   : > { %2058 = vpow2.f32 %v1356_v51  ;;  %v994_v22 = vmul.f32 %v2055_v3, %v2976_v50 }
 0x38b   : > { %v1507_v35 = vsub.f32 2.0, %v1491_v21  ;;  %v3016_v21 = vpop.f32.mrf.mxu1 }
 0x38c   : > { %v1010_v55 = vsub.f32 2.0, %v994_v22 }
 0x38d   : > { %v2987_v45 = vpop.xlane.xlu0 %1302  ;;  %v1523_v42 = vmul.f32 %v2053_v5, %v1507_v35 }
 0x38e   : > { %v1026_v40 = vmul.f32 %v2055_v3, %v1010_v55  ;;  %v1324_v49 = vsub.f32 %v2928_v53, %v2987_v45 }
 0x38f   : > { %v2057_v8 = vpop.eup %2056  ;;  %1541 = vperm.xlu0 %1994, %v1523_v42  }
 0x390   : > { %v2059_v38 = vpop.eup %2058  ;;  %v1005_v33 = vmul.f32 %v2057_v8, %v2983_v20  ;;  %v2991_v44 = vpop.f32.mrf.mxu3  ;;  %v1350_v11 = vmul.f32 1.442695, %v1324_v49 }
 0x391   : > { %1465 = vmatmul.f32.gmra.mxu3 %v2059_v38 }
 0x392   : > { %v1021_v24 = vsub.f32 2.0, %v1005_v33 }
 0x393   : > { %v1297_v39 = vpop.xlane.xlu2 %1296  ;;  %v3029_v55 = vpop.f32.mrf.mxu1 }
 0x394   : > { %v1321_v19 = vsub.f32 %v2936_v30, %v1297_v39  ;;  %v1037_v14 = vmul.f32 %v2057_v8, %v1021_v24  ;;  %v1346_v30 = vmul.f32 1.442695, %v1322_v16 }
 0x395   : > { %v1311_v26 = vpop.xlane.xlu0 %1310 }
 0x396   : > { %v1344_v48 = vmul.f32 1.442695, %v1321_v19  ;;  %v1328_v47 = vsub.f32 %v2943_v10, %v1311_v26  ;;  %1103 = vperm.xlu2 %1993, %v1037_v14  }
 0x397   : > { %1048 = vperm.xlu0 %1994, %v1026_v40  }
 0x398   : > { %2060 = vpow2.f32 %v1344_v48  ;;  %v1358_v31 = vmul.f32 1.442695, %v1328_v47  ;;  %v2997_v13 = vpop.f32.mrf.mxu3  ;;  %v3000_v57 = vpop.f32.mrf.mxu2 }
 0x399   : > { %2062 = vrcp.f32 %v2997_v13  ;;  %v1301_v10 = vpop.xlane.xlu1 %1300 }
 0x39a   : > { %2064 = vpow2.f32 %v1358_v31  ;;  %v1323_v23 = vsub.f32 %v2948_v56, %v1301_v10 }
 0x39b   : > { %2066 = vrcp.f32 %v3000_v57  ;;  %v3039_v16 = vpop.f32.mrf.mxu1 }
 0x39c   : > { %2068 = vrcp.f32 %v2991_v44  ;;  %v1348_v18 = vmul.f32 1.442695, %v1323_v23 }
 0x39d   : > { %v1313_v61 = vpop.xlane.xlu0 %1312  ;;  %2070 = vpow2.f32 %v1346_v30 }
 0x39e   : > { %v2061_v32 = vpop.eup %2060  ;;  %v1329_v58 = vsub.f32 %v2953_v25, %v1313_v61 }
 0x39f   : > { %v2063_v60 = vpop.eup %2062  ;;  %1447 = vmatmul.f32.gmra.mxu2 %v2061_v32 }
 0x3a0   : > { %v2065_v1 = vpop.eup %2064  ;;  %v1007_v52 = vmul.f32 %v2063_v60, %v2997_v13  ;;  %v1360_v46 = vmul.f32 1.442695, %v1329_v58  ;;  %v3022_v45 = vpop.f32.mrf.mxu3 }
 0x3a1   : > { %v2067_v59 = vpop.eup %2066  ;;  %1468 = vmatmul.f32.gmra.mxu3 %v2065_v1 }
 0x3a2   : > { %v1023_v15 = vsub.f32 2.0, %v1007_v52  ;;  %v1492_v9 = vmul.f32 %v2067_v59, %v3000_v57  ;;  %2072 = vpow2.f32 %v1360_v46  ;;  %v2069_v36 = vpop.eup %2068 }
 0x3a3   : > { %2074 = vrcp.f32 %v3007_v62  ;;  %v2071_v37 = vpop.eup %2070  ;;  %v1006_v56 = vmul.f32 %v2069_v36, %v2991_v44 }
 0x3a4   : > { %v1508_v25 = vsub.f32 2.0, %v1492_v9  ;;  %v1039_v17 = vmul.f32 %v2063_v60, %v1023_v15  ;;  %2076 = vpow2.f32 %v1348_v18 }
 0x3a5   : > { %v1022_v34 = vsub.f32 2.0, %v1006_v56  ;;  %2078 = vpow2.f32 %v1350_v11 }
 0x3a6   : > { %v1524_v0 = vmul.f32 %v2067_v59, %v1508_v25  ;;  %1113 = vperm.xlu0 %1994, %v1039_v17   ;;  %v3052_v17 = vpop.f32.mrf.mxu1 }
 0x3a7   : > { %1450 = vmatmul.f32.gmra.mxu2 %v2071_v37  ;;  %v1038_v27 = vmul.f32 %v2069_v36, %v1022_v34 }
 0x3a8   : > { %v2073_v6 = vpop.eup %2072  ;;  %1546 = vperm.xlu1 %1995, %v1524_v0  }
 0x3a9   : > { %1471 = vmatmul.f32.gmra.mxu3 %v2073_v6  ;;  %v2075_v12 = vpop.eup %2074 }
 0x3aa   : > { %v2077_v29 = vpop.eup %2076  ;;  %v995_v41 = vmul.f32 %v2075_v12, %v3007_v62 }
 0x3ab   : > { %v2079_v2 = vpop.eup %2078 }
 0x3ac   : > { %v1011_v43 = vsub.f32 2.0, %v995_v41 }
 0x3ae   : > { %v1027_v63 = vmul.f32 %v2075_v12, %v1011_v43  ;;  %v3057_v41 = vpop.f32.mrf.mxu1 }
 0x3af   : > { %1453 = vmatmul.f32.gmra.mxu2 %v2077_v29 }
 0x3b0   : > { %1108 = vperm.xlu1 %1995, %v1038_v27  }
 0x3b7   : > { %1456 = vmatmul.f32.gmra.mxu2 %v2079_v2 }
 0x3b8   : > { %1053 = vperm.xlu1 %1995, %v1027_v63  }
 0x3d6   : > { %v1305_v4 = vpop.xlane.xlu2 %1304 }
 0x3d7   : > { %v1325_v53 = vsub.f32 %v2966_v28, %v1305_v4 }
 0x3d9   : > { %v1352_v51 = vmul.f32 1.442695, %v1325_v53  ;;  %v3063_v53 = vpop.f32.mrf.mxu1 }
 0x3db   : > { %2080 = vpow2.f32 %v1352_v51 }
 0x3e1   : > { %v2081_v5 = vpop.eup %2080  ;;  %v3018_v3 = vpop.f32.mrf.mxu2 }
 0x3e2   : > { %2082 = vrcp.f32 %v3018_v3  ;;  %1459 = vmatmul.f32.gmra.mxu2 %v2081_v5 }
 0x3e3   : > { %2084 = vrcp.f32 %v3016_v21 }
 0x3e8   : > { %v2083_v35 = vpop.eup %2082 }
 0x3e9   : > { %v1493_v22 = vmul.f32 %v2083_v35, %v3018_v3  ;;  %v3025_v42 = vpop.f32.mrf.mxu2  ;;  %v2085_v28 = vpop.eup %2084 }
 0x3ea   : > { %2086 = vrcp.f32 %v3025_v42  ;;  %v996_v38 = vmul.f32 %v2085_v28, %v3016_v21 }
 0x3eb   : > { %v1509_v8 = vsub.f32 2.0, %v1493_v22 }
 0x3ec   : > { %v1012_v24 = vsub.f32 2.0, %v996_v38  ;;  %v3073_v38 = vpop.f32.mrf.mxu1 }
 0x3ed   : > { %v1525_v33 = vmul.f32 %v2083_v35, %v1509_v8 }
 0x3ee   : > { %v3031_v39 = vpop.f32.mrf.mxu3  ;;  %v1028_v48 = vmul.f32 %v2085_v28, %v1012_v24 }
 0x3ef   : > { %1551 = vperm.xlu2 %1993, %v1525_v33  }
 0x3f0   : > { %v2087_v14 = vpop.eup %2086 }
 0x3f1   : > { %v3033_v19 = vpop.f32.mrf.mxu2  ;;  %v1494_v26 = vmul.f32 %v2087_v14, %v3025_v42 }
 0x3f2   : > { %2088 = vrcp.f32 %v3033_v19 }
 0x3f3   : > { %2090 = vrcp.f32 %v3029_v55  ;;  %v1510_v31 = vsub.f32 2.0, %v1494_v26 }
 0x3f4   : > { %2092 = vrcp.f32 %v3031_v39 }
 0x3f5   : > { %2094 = vrcp.f32 %v3039_v16  ;;  %v1526_v23 = vmul.f32 %v2087_v14, %v1510_v31 }
 0x3f7   : > { %1058 = vperm.xlu2 %1993, %v1028_v48  }
 0x3f8   : > { %v2089_v47 = vpop.eup %2088 }
 0x3f9   : > { %v2091_v40 = vpop.eup %2090  ;;  %v1495_v30 = vmul.f32 %v2089_v47, %v3033_v19  ;;  %v3042_v10 = vpop.f32.mrf.mxu2 }
 0x3fa   : > { %v2093_v61 = vpop.eup %2092  ;;  %v997_v58 = vmul.f32 %v2091_v40, %v3029_v55 }
 0x3fb   : > { %v1511_v32 = vsub.f32 2.0, %v1495_v30  ;;  %v1503_v60 = vmul.f32 %v2093_v61, %v3031_v39  ;;  %v2095_v15 = vpop.eup %2094 }
 0x3fc   : > { %v1013_v52 = vsub.f32 2.0, %v997_v58  ;;  %v998_v9 = vmul.f32 %v2095_v15, %v3039_v16 }
 0x3fd   : > { %v1527_v1 = vmul.f32 %v2089_v47, %v1511_v32  ;;  %v1519_v46 = vsub.f32 2.0, %v1503_v60 }
 0x3fe   : > { %v1029_v18 = vmul.f32 %v2091_v40, %v1013_v52  ;;  %v1014_v37 = vsub.f32 2.0, %v998_v9 }
 0x3ff   : > { %1561 = vperm.xlu1 %1995, %v1527_v1   ;;  %1556 = vperm.xlu2 %1993, %v1526_v23   ;;  %v1535_v36 = vmul.f32 %v2093_v61, %v1519_v46  ;;  %v3086_v1 = vpop.f32.mrf.mxu1 }
 0x400   : > { %v1030_v12 = vmul.f32 %v2095_v15, %v1014_v37 }
 0x401   : > { %v3047_v59 = vpop.f32.mrf.mxu2 }
 0x402   : > { %2096 = vrcp.f32 %v3047_v59 }
 0x403   : > { %2098 = vrcp.f32 %v3042_v10 }
 0x404   : > { %2100 = vrcp.f32 %v3052_v17 }
 0x407   : > { %1601 = vperm.xlu1 %1995, %v1535_v36   ;;  %1063 = vperm.xlu2 %1993, %v1029_v18  }
 0x408   : > { %v2097_v25 = vpop.eup %2096 }
 0x409   : > { %v1497_v56 = vmul.f32 %v2097_v25, %v3047_v59  ;;  %v2099_v0 = vpop.eup %2098 }
 0x40a   : > { %v1496_v49 = vmul.f32 %v2099_v0, %v3042_v10  ;;  %v2101_v29 = vpop.eup %2100 }
 0x40b   : > { %v1513_v6 = vsub.f32 2.0, %v1497_v56  ;;  %v999_v43 = vmul.f32 %v2101_v29, %v3052_v17 }
 0x40c   : > { %v1512_v11 = vsub.f32 2.0, %v1496_v49 }
 0x40d   : > { %v1529_v34 = vmul.f32 %v2097_v25, %v1513_v6  ;;  %v1015_v63 = vsub.f32 2.0, %v999_v43 }
 0x40e   : > { %v1528_v2 = vmul.f32 %v2099_v0, %v1512_v11 }
 0x40f   : > { %1571 = vperm.xlu1 %1995, %v1529_v34   ;;  %1068 = vperm.xlu2 %1993, %v1030_v12   ;;  %v1031_v5 = vmul.f32 %v2101_v29, %v1015_v63  ;;  %v3095_v34 = vpop.permute.xlu2 %1043  ;;  %v3097_v12 = vpop.f32.mrf.mxu1 }
 0x414   : > { %v3059_v27 = vpop.f32.mrf.mxu3 }
 0x415   : > { %2102 = vrcp.f32 %v3059_v27 }
 0x417   : > { %1566 = vperm.xlu2 %1993, %v1528_v2  }
 0x41b   : > { %v2103_v4 = vpop.eup %2102 }
 0x41c   : > { %v1504_v51 = vmul.f32 %v2103_v4, %v3059_v27 }
 0x41e   : > { %v1520_v35 = vsub.f32 2.0, %v1504_v51 }
 0x41f   : > { %1073 = vperm.xlu2 %1993, %v1031_v5  }
 0x420   : > { %v1536_v22 = vmul.f32 %v2103_v4, %v1520_v35 }
 0x422   : > { %v3066_v28 = vpop.f32.mrf.mxu2  ;;  %1606 = vperm.xlu0 %1994, %v1536_v22  }
 0x423   : > { %2104 = vrcp.f32 %v3066_v28 }
 0x424   : > { %2106 = vrcp.f32 %v3063_v53  ;;  %v3070_v8 = vpop.f32.mrf.mxu3 }
 0x425   : > { %2108 = vrcp.f32 %v3070_v8 }
 0x426   : > { %2110 = vrcp.f32 %v3057_v41 }
 0x429   : > { %v2105_v33 = vpop.eup %2104 }
 0x42a   : > { %v2107_v24 = vpop.eup %2106  ;;  %v1498_v14 = vmul.f32 %v2105_v33, %v3066_v28  ;;  %v3077_v26 = vpop.f32.mrf.mxu2 }
 0x42b   : > { %v2109_v48 = vpop.eup %2108  ;;  %v1001_v61 = vmul.f32 %v2107_v24, %v3063_v53 }
 0x42c   : > { %v1514_v47 = vsub.f32 2.0, %v1498_v14  ;;  %v1505_v40 = vmul.f32 %v2109_v48, %v3070_v8  ;;  %v3080_v31 = vpop.f32.mrf.mxu3  ;;  %v2111_v30 = vpop.eup %2110 }
 0x42d   : > { %2112 = vrcp.f32 %v3080_v31  ;;  %v1000_v60 = vmul.f32 %v2111_v30, %v3057_v41  ;;  %v1017_v52 = vsub.f32 2.0, %v1001_v61 }
 0x42e   : > { %v1521_v32 = vsub.f32 2.0, %v1505_v40  ;;  %v1530_v58 = vmul.f32 %v2105_v33, %v1514_v47  ;;  %2114 = vrcp.f32 %v3077_v26 }
 0x42f   : > { %v1016_v9 = vsub.f32 2.0, %v1000_v60  ;;  %v1033_v37 = vmul.f32 %v2107_v24, %v1017_v52  ;;  %v3106_v24 = vpop.permute.xlu2 %1103 }
 0x430   : > { %1576 = vperm.xlu0 %1994, %v1530_v58   ;;  %v1537_v23 = vmul.f32 %v2109_v48, %v1521_v32 }
 0x431   : > { %v1032_v6 = vmul.f32 %v2111_v30, %v1016_v9 }
 0x432   : > { %v3088_v46 = vpop.f32.mrf.mxu2  ;;  %1611 = vperm.xlu2 %1993, %v1537_v23   ;;  %v1542_v23 = vpop.permute.xlu0 %1541 }
 0x433   : > { %v2113_v15 = vpop.eup %2112  ;;  %2116 = vrcp.f32 %v3088_v46  ;;  %v1619_v9 = vmul.f32 %v1542_v23, %v2978_v7 }
 0x434   : > { %v1506_v36 = vmul.f32 %v2113_v15, %v3080_v31  ;;  %v2115_v18 = vpop.eup %2114  ;;  %2118 = vrcp.f32 %v3073_v38 }
 0x435   : > { %2120 = vrcp.f32 %v3086_v1  ;;  %v1499_v56 = vmul.f32 %v2115_v18, %v3077_v26 }
 0x436   : > { %v1522_v25 = vsub.f32 2.0, %v1506_v36 }
 0x437   : > { %v1515_v2 = vsub.f32 2.0, %v1499_v56 }
 0x438   : > { %1083 = vperm.xlu0 %1994, %v1033_v37   ;;  %v1538_v0 = vmul.f32 %v2113_v15, %v1522_v25  ;;  %v1635_v25 = vmax.f32 %v1619_v9, 0.0 }
 0x439   : > { %v2117_v49 = vpop.eup %2116  ;;  %v1531_v35 = vmul.f32 %v2115_v18, %v1515_v2  ;;  %v1547_v18 = vpop.permute.xlu1 %1546 }
 0x43a   : > { %v1500_v11 = vmul.f32 %v2117_v49, %v3088_v46  ;;  %v3100_v29 = vpop.f32.mrf.mxu2  ;;  %1616 = vperm.xlu1 %1995, %v1538_v0   ;;  %1078 = vperm.xlu2 %1993, %v1032_v6   ;;  %v2119_v43 = vpop.eup %2118  ;;  %v1620_v56 = vmul.f32 %v1547_v18, %v3000_v57 }
 0x43b   : > { %2122 = vrcp.f32 %v3100_v29  ;;  %v2121_v4 = vpop.eup %2120  ;;  %v1002_v51 = vmul.f32 %v2119_v43, %v3073_v38 }
 0x43c   : > { %v1516_v63 = vsub.f32 2.0, %v1500_v11  ;;  %2124 = vrcp.f32 %v3097_v12  ;;  %v1003_v5 = vmul.f32 %v2121_v4, %v3086_v1  ;;  %v1636_v0 = vmax.f32 %v1620_v56, 0.0 }
 0x43d   : > { %v1018_v47 = vsub.f32 2.0, %v1002_v51 }
 0x43e   : > { %v1532_v22 = vmul.f32 %v2117_v49, %v1516_v63  ;;  %v1019_v40 = vsub.f32 2.0, %v1003_v5 }
 0x43f   : > { %v1034_v58 = vmul.f32 %v2119_v43, %v1018_v47 }
 0x440   : > { %v1035_v60 = vmul.f32 %v2121_v4, %v1019_v40 }
 0x441   : > { %v2123_v33 = vpop.eup %2122  ;;  %v3118_v7 = vpop.permute.xlu1 %1108 }
 0x442   : > { %v1501_v14 = vmul.f32 %v2123_v33, %v3100_v29  ;;  %1586 = vperm.xlu1 %1995, %v1532_v22   ;;  %1581 = vperm.xlu2 %1993, %v1531_v35   ;;  %v2125_v48 = vpop.eup %2124 }
 0x443   : > { %v1004_v61 = vmul.f32 %v2125_v48, %v3097_v12 }
 0x444   : > { %v1517_v30 = vsub.f32 2.0, %v1501_v14 }
 0x445   : > { %v1020_v15 = vsub.f32 2.0, %v1004_v61 }
 0x446   : > { %v1533_v32 = vmul.f32 %v2123_v33, %v1517_v30 }
 0x447   : > { %v1036_v36 = vmul.f32 %v2125_v48, %v1020_v15 }
 0x448   : > { %1591 = vperm.xlu0 %1994, %v1533_v32  }
 0x449   : > { %v1552_v52 = vpop.permute.xlu2 %1551  ;;  %v3126_v57 = vpop.permute.xlu1 %1053 }
 0x44a   : > { %1088 = vperm.xlu2 %1993, %v1034_v58   ;;  %1093 = vperm.xlu1 %1995, %v1035_v60   ;;  %v1621_v60 = vmul.f32 %v1552_v52, %v3018_v3 }
 0x44c   : > { %v1637_v23 = vmax.f32 %v1621_v60, 0.0 }
 0x450   : > { %1098 = vperm.xlu0 %1994, %v1036_v36  }
 0x451   : > { %v3111_v37 = vpop.permute.xlu2 %1058 }
 0x452   : > { %1667 = vrot.lane.b32.xlu1 %v1635_v25, %s2144_s19  ;;  %v1049_v25 = vpop.permute.xlu0 %1048  ;;  %v1124_v60 = vmul.f32 %v3111_v37, %v3016_v21 }
 0x458   : > { %1669 = vrot.lane.b32.xlu0 %v1636_v0, %s2144_s19 }
 0x459   : > { %v1557_v6 = vpop.permute.xlu2 %1556 }
 0x45a   : > { %v1622_v49 = vmul.f32 %v1557_v6, %v3025_v42  ;;  %v3144_v52 = vpop.permute.xlu0 %1113 }
 0x45c   : > { %v1638_v11 = vmax.f32 %v1622_v49, 0.0 }
 0x45e   : > { %1673 = vrot.lane.b32.xlu1 %v1638_v11, %s2144_s19 }
 0x461   : > { %v3122_v2 = vpop.permute.xlu2 %1063 }
 0x465   : > { %v3120_v43 = vpop.f32.mrf.mxu2 }
 0x466   : > { %2126 = vrcp.f32 %v3120_v43 }
 0x467   : > { %2128 = vrcp.f32 %v3022_v45 }
 0x469   : > { %v3129_v5 = vpop.permute.xlu2 %1068 }
 0x46c   : > { %v2127_v63 = vpop.eup %2126 }
 0x46d   : > { %v1502_v4 = vmul.f32 %v2127_v63, %v3120_v43  ;;  %v2129_v51 = vpop.eup %2128 }
 0x46e   : > { %v1008_v35 = vmul.f32 %v2129_v51, %v3022_v45 }
 0x46f   : > { %v1518_v42 = vsub.f32 2.0, %v1502_v4 }
 0x470   : > { %v1024_v47 = vsub.f32 2.0, %v1008_v35 }
 0x471   : > { %v1534_v22 = vmul.f32 %v2127_v63, %v1518_v42  ;;  %v1562_v33 = vpop.permute.xlu1 %1561  ;;  %v1567_v61 = vpop.permute.xlu2 %1566 }
 0x472   : > { %v1623_v14 = vmul.f32 %v1562_v33, %v3033_v19  ;;  %v1040_v40 = vmul.f32 %v2129_v51, %v1024_v47  ;;  %v1624_v18 = vmul.f32 %v1567_v61, %v3042_v10  ;;  %v1121_v47 = vmul.f32 %v3095_v34, %v2969_v54 }
 0x473   : > { %1596 = vperm.xlu2 %1993, %v1534_v22  }
 0x474   : > { %v1639_v48 = vmax.f32 %v1623_v14, 0.0  ;;  %v1137_v61 = vmax.f32 %v1121_v47, 0.0 }
 0x476   : > { %1675 = vrot.lane.b32.xlu0 %v1639_v48, %s2144_s19 }
 0x479   : > { %v1602_v30 = vpop.permute.xlu1 %1601  ;;  %v3139_v9 = vpop.permute.xlu2 %1073 }
 0x47a   : > { %v1631_v32 = vmul.f32 %v1602_v30, %v3031_v39  ;;  %v1640_v39 = vmax.f32 %v1624_v18, 0.0 }
 0x47b   : > { %1118 = vperm.xlu2 %1993, %v1040_v40  }
 0x47c   : > { %v1647_v58 = vmax.f32 %v1631_v32, 0.0 }
 0x47e   : > { %1691 = vrot.lane.b32.xlu1 %v1647_v58, %s2144_s19 }
 0x481   : > { %v1572_v15 = vpop.permute.xlu1 %1571 }
 0x482   : > { %v1625_v19 = vmul.f32 %v1572_v15, %v3047_v59 }
 0x483   : > { %1671 = vrot.lane.b32.xlu2 %v1637_v23, %s2144_s19 }
 0x484   : > { %v1641_v36 = vmax.f32 %v1625_v19, 0.0  ;;  %v1140_v19 = vmax.f32 %v1124_v60, 0.0 }
 0x486   : > { %1679 = vrot.lane.b32.xlu1 %v1641_v36, %s2144_s19 }
 0x48b   : > { %1677 = vrot.lane.b32.xlu2 %v1640_v39, %s2144_s19 }
 0x48c   : > { %v1612_v3 = vpop.permute.xlu2 %1611 }
 0x48d   : > { %v1633_v21 = vmul.f32 %v1612_v3, %v3070_v8  ;;  %v1125_v8 = vmul.f32 %v3122_v2, %v3029_v55  ;;  %v1127_v2 = vmul.f32 %v3139_v9, %v3052_v17 }
 0x494   : > { %v3146_v56 = vpop.permute.xlu2 %1078  ;;  %v1607_v0 = vpop.permute.xlu0 %1606 }
 0x49c   : > { %v1582_v59 = vpop.permute.xlu2 %1581 }
 0x49d   : > { %v1627_v6 = vmul.f32 %v1582_v59, %v3077_v26 }
 0x49f   : > { %v1643_v49 = vmax.f32 %v1627_v6, 0.0 }
 0x4a1   : > { %1683 = vrot.lane.b32.xlu2 %v1643_v49, %s2144_s19  ;;  %v1126_v49 = vmul.f32 %v3129_v5, %v3039_v16  ;;  %v1133_v16 = vmul.f32 %v3106_v24, %v2983_v20 }
 0x4a2   : > { %v1577_v11 = vpop.permute.xlu0 %1576 }
 0x4a3   : > { %v1626_v10 = vmul.f32 %v1577_v11, %v3066_v28  ;;  %v1142_v3 = vmax.f32 %v1126_v49, 0.0  ;;  %v1149_v5 = vmax.f32 %v1133_v16, 0.0 }
 0x4a5   : > { %v1642_v63 = vmax.f32 %v1626_v10, 0.0 }
 0x4a7   : > { %1681 = vrot.lane.b32.xlu0 %v1642_v63, %s2144_s19 }
 0x4aa   : > { %v3152_v51 = vpop.permute.xlu0 %1083 }
 0x4ac   : > { %v1617_v4 = vpop.permute.xlu1 %1616 }
 0x4ad   : > { %v1634_v33 = vmul.f32 %v1617_v4, %v3080_v31  ;;  %v1122_v31 = vmul.f32 %v1049_v25, %v2976_v50  ;;  %v1123_v25 = vmul.f32 %v3126_v57, %v3007_v62  ;;  %v1141_v57 = vmax.f32 %v1125_v8, 0.0 }
 0x4af   : > { %v1650_v40 = vmax.f32 %v1634_v33, 0.0  ;;  %v1138_v32 = vmax.f32 %v1122_v31, 0.0 }
 0x4b4   : > { %v1587_v42 = vpop.permute.xlu1 %1586 }
 0x4b5   : > { %v1628_v35 = vmul.f32 %v1587_v42, %v3088_v46  ;;  %v1632_v46 = vmul.f32 %v1607_v0, %v3059_v27  ;;  %v1089_v27 = vpop.permute.xlu2 %1088  ;;  %v1649_v0 = vmax.f32 %v1633_v21, 0.0  ;;  %v1129_v42 = vmul.f32 %v3152_v51, %v3063_v53 }
 0x4b6   : > { %v1130_v51 = vmul.f32 %v1089_v27, %v3073_v38 }
 0x4b7   : > { %v1644_v22 = vmax.f32 %v1628_v35, 0.0  ;;  %v1648_v34 = vmax.f32 %v1632_v46, 0.0  ;;  %v1143_v35 = vmax.f32 %v1127_v2, 0.0  ;;  %v1145_v33 = vmax.f32 %v1129_v42, 0.0 }
 0x4b8   : > { %v1146_v47 = vmax.f32 %v1130_v51, 0.0 }
 0x4b9   : > { %1685 = vrot.lane.b32.xlu1 %v1644_v22, %s2144_s19 }
 0x4ba   : > { %v1592_v26 = vpop.permute.xlu0 %1591 }
 0x4bb   : > { %v1629_v14 = vmul.f32 %v1592_v26, %v3100_v29 }
 0x4bc   : > { %v3158_v48 = vpop.permute.xlu1 %1093 }
 0x4bd   : > { %v1645_v28 = vmax.f32 %v1629_v14, 0.0  ;;  %v1128_v14 = vmul.f32 %v3146_v56, %v3057_v41 }
 0x4bf   : > { %1687 = vrot.lane.b32.xlu0 %v1645_v28, %s2144_s19  ;;  %v1144_v17 = vmax.f32 %v1128_v14, 0.0 }
 0x4c1   : > { %1697 = vrot.lane.b32.xlu1 %v1650_v40, %s2144_s19 }
 0x4c2   : > { %v3165_v30 = vpop.permute.xlu0 %1098 }
 0x4c3   : > { %v1132_v28 = vmul.f32 %v3165_v30, %v3097_v12  ;;  %v1135_v12 = vmul.f32 %v3144_v52, %v2997_v13 }
 0x4c4   : > { %v1668_v54 = vpop.permute.xlu1 %1667 }
 0x4c5   : > { %v1716_v29 = vsel %vm1715_vm5, %v1137_v61, %v1668_v54  ;;  %v1148_v40 = vmax.f32 %v1132_v28, 0.0  ;;  %v1131_v61 = vmul.f32 %v3158_v48, %v3086_v1 }
 0x4c6   : > { %1732 = vst.msk [vmem:[%s3172_s24] sm:$0xff] %vm288_vm0, %v1716_v29  ;;  %v1134_v29 = vmul.f32 %v3118_v7, %v2991_v44 }
 0x4c7   : > { %1693 = vrot.lane.b32.xlu0 %v1648_v34, %s2144_s19  ;;  %v1147_v30 = vmax.f32 %v1131_v61, 0.0  ;;  %v1151_v34 = vmax.f32 %v1135_v12, 0.0 }
 0x4c8   : > { %v1150_v52 = vmax.f32 %v1134_v29, 0.0 }
 0x4ca   : > { %v1670_v58 = vpop.permute.xlu0 %1669 }
 0x4cb   : > { %v1717_v23 = vsel %vm1715_vm5, %v1138_v32, %v1670_v58 }
 0x4cc   : > { %1733 = vst.msk [vmem:[%s3172_s24 + $0x8] sm:$0xff] %vm288_vm0, %v1717_v23 }
 0x4cd   : > { %v1597_v15 = vpop.permute.xlu2 %1596 }
 0x4ce   : > { %v1630_v50 = vmul.f32 %v1597_v15, %v3120_v43  ;;  %v1139_v43 = vmax.f32 %v1123_v25, 0.0 }
 0x4d0   : > { %v1646_v36 = vmax.f32 %v1630_v50, 0.0  ;;  %v1674_v18 = vpop.permute.xlu1 %1673 }
 0x4d1   : > { %v1719_v39 = vsel %vm1715_vm5, %v1140_v19, %v1674_v18 }
 0x4d2   : > { %1735 = vst.msk [vmem:[%s3172_s24 + $0x18] sm:$0xff] %vm288_vm0, %v1719_v39  ;;  %1689 = vrot.lane.b32.xlu2 %v1646_v36, %s2144_s19 }
 0x4d5   : > { %v1119_v37 = vpop.permute.xlu2 %1118 }
 0x4d6   : > { %v1136_v38 = vmul.f32 %v1119_v37, %v3022_v45 }
 0x4d8   : > { %v1152_v1 = vmax.f32 %v1136_v38, 0.0 }
 0x4da   : > { %1695 = vrot.lane.b32.xlu2 %v1649_v0, %s2144_s19 }
 0x4dd   : > { %v1672_v59 = vpop.permute.xlu2 %1671 }
 0x4de   : > { %v1718_v6 = vsel %vm1715_vm5, %v1139_v43, %v1672_v59 }
 0x4df   : > { %1734 = vst.msk [vmem:[%s3172_s24 + $0x10] sm:$0xff] %vm288_vm0, %v1718_v6 }
 0x4e5   : > { %v1678_v11 = vpop.permute.xlu2 %1677 }
 0x4e6   : > { %v1721_v62 = vsel %vm1715_vm5, %v1142_v3, %v1678_v11 }
 0x4e7   : > { %1737 = vst.msk [vmem:[%s3172_s24 + $0x28] sm:$0xff] %vm288_vm0, %v1721_v62 }
 0x4e8   : > { %v1676_v10 = vpop.permute.xlu0 %1675 }
 0x4e9   : > { %v1720_v63 = vsel %vm1715_vm5, %v1141_v57, %v1676_v10 }
 0x4ea   : > { %1736 = vst.msk [vmem:[%s3172_s24 + $0x20] sm:$0xff] %vm288_vm0, %v1720_v63 }
 0x4f0   : > { %v1692_v4 = vpop.permute.xlu1 %1691 }
 0x4f1   : > { %v1728_v55 = vsel %vm1715_vm5, %v1149_v5, %v1692_v4 }
 0x4f2   : > { %1744 = vst.msk [vmem:[%s3172_s24 + $0x60] sm:$0xff] %vm288_vm0, %v1728_v55 }
 0x4f8   : > { %v1680_v22 = vpop.permute.xlu1 %1679 }
 0x4f9   : > { %v1722_v26 = vsel %vm1715_vm5, %v1143_v35, %v1680_v22 }
 0x4fa   : > { %1738 = vst.msk [vmem:[%s3172_s24 + $0x30] sm:$0xff] %vm288_vm0, %v1722_v26 }
 0x4fb   : > { %v1684_v20 = vpop.permute.xlu2 %1683 }
 0x4fc   : > { %v1724_v24 = vsel %vm1715_vm5, %v1145_v33, %v1684_v20 }
 0x4fd   : > { %1740 = vst.msk [vmem:[%s3172_s24 + $0x40] sm:$0xff] %vm288_vm0, %v1724_v24 }
 0x519   : > { %v1682_v9 = vpop.permute.xlu0 %1681 }
 0x51a   : > { %v1723_v53 = vsel %vm1715_vm5, %v1144_v17, %v1682_v9 }
 0x51b   : > { %1739 = vst.msk [vmem:[%s3172_s24 + $0x38] sm:$0xff] %vm288_vm0, %v1723_v53 }
 0x52b   : > { %v1686_v46 = vpop.permute.xlu1 %1685 }
 0x52c   : > { %v1725_v41 = vsel %vm1715_vm5, %v1146_v47, %v1686_v46  ;;  %v1690_v56 = vpop.permute.xlu2 %1689 }
 0x52d   : > { %1741 = vst.msk [vmem:[%s3172_s24 + $0x48] sm:$0xff] %vm288_vm0, %v1725_v41  ;;  %v1727_v54 = vsel %vm1715_vm5, %v1148_v40, %v1690_v56 }
 0x52e   : > { %1743 = vst.msk [vmem:[%s3172_s24 + $0x58] sm:$0xff] %vm288_vm0, %v1727_v54 }
 0x531   : > { %v1688_v31 = vpop.permute.xlu0 %1687 }
 0x532   : > { %v1726_v48 = vsel %vm1715_vm5, %v1147_v30, %v1688_v31 }
 0x533   : > { %1742 = vst.msk [vmem:[%s3172_s24 + $0x50] sm:$0xff] %vm288_vm0, %v1726_v48  ;;  %v1698_v27 = vpop.permute.xlu1 %1697 }
 0x534   : > { %v1731_v45 = vsel %vm1715_vm5, %v1152_v1, %v1698_v27  ;;  %v1696_v32 = vpop.permute.xlu2 %1695 }
 0x535   : > { %1747 = vst.msk [vmem:[%s3172_s24 + $0x78] sm:$0xff] %vm288_vm0, %v1731_v45  ;;  %v1730_v13 = vsel %vm1715_vm5, %v1151_v34, %v1696_v32 }
 0x536   : > { %1746 = vst.msk [vmem:[%s3172_s24 + $0x70] sm:$0xff] %vm288_vm0, %v1730_v13 }
 0x539   : > { %v1694_v58 = vpop.permute.xlu0 %1693 }
 0x53a   : > { %v1729_v60 = vsel %vm1715_vm5, %v1150_v52, %v1694_v58 }
 0x53b   : > { %1745 = vst.msk [vmem:[%s3172_s24 + $0x68] sm:$0xff] %vm288_vm0, %v1729_v60 }
 0x53c PF: > { %s16_s21 = sadd.s32 1, %s2136_s21  }
 0x53d   : > { %p13_p4 = scmp.ge.s32.totalorder %s16_s21, 4  }
 0x53f   :  { %15 = sbr.rel (!%p13_p4) target bundleno = 1 (0x1), region = 77 }

</bundles_post_ra>
